<compile_context>
chip_gen: v5e
topology: v5e:2x2
jax: 0.10.0
libtpu: 0.0.40
codegen_flags: <defaults>
</compile_context>

<pallas_src>
import functools

import jax
import jax.numpy as jnp
import numpy as np
from jax import lax
from jax.experimental import pallas as pl
from jax.experimental.pallas import tpu as pltpu


def _softplus(z):
    # log(1 + exp(z)), numerically stable
    return jnp.logaddexp(z, 0.0)


def _log_g(z):
    # log_g(x) = where(x >= 0, log(relu(x) + 0.5), -softplus(-x))
    return jnp.where(z >= 0, jnp.log(jnp.maximum(z, 0.0) + 0.5), -_softplus(-z))


def minlstm_kernel(x_ref, h0_ref, w_ref, b_ref, tri_ref, o_ref,
                   a_carry, m_carry, s_carry, *, fast):
    Bb, Tc, D = x_ref.shape
    H = o_ref.shape[-1]
    t_idx = pl.program_id(1)

    # Reset the per-batch-block scan carry at the first time chunk.
    @pl.when(t_idx == 0)
    def _():
        a_carry[...] = jnp.zeros_like(a_carry)
        m_carry[...] = _log_g(h0_ref[...].astype(jnp.float32))   # running max seeded at log_h0
        s_carry[...] = jnp.ones_like(s_carry)                    # exp(log_h0 - log_h0) = 1

    # One fused projection for all Bb*Tc rows: (Bb*Tc, D) @ (D, 3H).
    # w_ref carries the operand dtype chosen by the wrapper (bf16 in fast mode);
    # accumulation stays f32 and the f32 bias is added afterwards.
    x2d = x_ref[...].reshape(Bb * Tc, D).astype(w_ref.dtype)
    proj = jnp.dot(x2d, w_ref[...], preferred_element_type=jnp.float32) + b_ref[...]
    f_lin = proj[:, 0 * H:1 * H]
    i_lin = proj[:, 1 * H:2 * H]
    h_lin = proj[:, 2 * H:3 * H]
    # TODO(synk): when H is not a multiple of 128, pad each gate to a lane tile
    # in the fused W/b so these slices stay lane-aligned, and store a lane-dense
    # (Tc, Bb*H) output slab transposed back in the wrapper (biggest win on v5e).

    diff = _softplus(-f_lin) - _softplus(-i_lin)
    spd = _softplus(diff)
    log_f_all = -spd                         # -softplus(diff)
    d_all = (diff - spd) + _log_g(h_lin)     # log_i + log_tilde_h  (log_i = diff - softplus(diff))
    # TODO(synk): on v6e/v7x (bf16 EUP/VPU) this transcendental chain could run
    # in bf16; kept f32 because log_f errors get summed over T and exponentiated.

    tri = tri_ref[...]                       # (Tc, Tc) lower-triangular ones; bf16 in fast mode

    # Static loop over the (small, <= 4) batch block.
    # TODO(synk): on v6e/v7x the per-bi tri matmuls (N = H) could be batched to a
    # single (Tc,Tc)@(Tc,Bb*H) matmul via one relayout to fill the 256-wide MXU.
    for bi in range(Bb):
        rows = slice(bi * Tc, (bi + 1) * Tc)
        lf = log_f_all[rows]                                        # (Tc, H) f32

        # Cumulative sum of log_f.  Errors here get exponentiated, so the fast
        # path uses a 2-term bf16 hi/lo split (tri is exact in bf16) instead of
        # an f32-rate MXU pass.
        if fast:
            lf_hi = lf.astype(jnp.bfloat16)
            lf_lo = (lf - lf_hi.astype(jnp.float32)).astype(jnp.bfloat16)
            cum_lf = (jnp.dot(tri, lf_hi, preferred_element_type=jnp.float32)
                      + jnp.dot(tri, lf_lo, preferred_element_type=jnp.float32))
        else:
            cum_lf = jnp.dot(tri, lf, preferred_element_type=jnp.float32)

        a_tot = a_carry[bi] + cum_lf                                 # A[t] for this chunk
        d = d_all[rows] - a_tot                                      # log_i + log_th - A

        # Stabilized cumulative sum-of-exp with a running (max, sum) carry.
        m_prev = m_carry[bi]                                         # (1, H)
        m_new = jnp.maximum(m_prev, jnp.max(d, axis=0, keepdims=True))
        s_base = s_carry[bi] * jnp.exp(m_prev - m_new)               # rescaled prefix sum

        p = jnp.exp(d - m_new)                                       # in (0, 1]
        if fast:
            s_run = s_base + jnp.dot(tri, p.astype(jnp.bfloat16),
                                     preferred_element_type=jnp.float32)
        else:
            s_run = s_base + jnp.dot(tri, p, preferred_element_type=jnp.float32)

        # h = exp(A + m + log(S)); the log form avoids inf * 0 -> NaN when the
        # shared per-chunk max m is driven by a much later timestep than t.
        o_ref[bi] = jnp.exp(a_tot + m_new + jnp.log(s_run)).astype(o_ref.dtype)

        # Carry to the next time chunk.
        a_carry[bi] = a_tot[Tc - 1:, :]
        m_carry[bi] = m_new
        s_carry[bi] = s_run[Tc - 1:, :]


def _vmem_capacity_bytes():
    try:
        return int(pltpu.get_tpu_info().vmem_capacity_bytes)
    except Exception:
        return 128 * 1024 * 1024   # v5e/v6e default; v7x has 64 MiB


def _pick_time_chunk(T, max_chunk):
    for tc in range(min(T, max_chunk), 7, -1):
        if T % tc == 0 and tc % 8 == 0:
            return tc
    return T


def _pick_batch_block(B, Tc, D, H, vmem_cap):
    # Rough f32 working set per batch row per step: x + proj + gating/scan temps.
    per_batch = 4 * Tc * (D + 12 * H)
    budget = max(vmem_cap // 6, 4 * 1024 * 1024)
    for cand in (4, 2, 1):                    # cap at 4: bound unrolled live ranges
        if B % cand != 0 or cand * per_batch > budget:
            continue
        if B // cand >= 2 or B < 2:           # keep >= 2 batch tiles for 2-TC v7x
            return cand
    return 1


def minlstm_forward(x, h0, params, *, max_time_chunk=128, batch_block=None,
                    fast=True, single_buffer_consts=True):
    """MinLSTM forward.

    fast=True (default): bf16 MXU operands with f32 accumulation for the
    projection, bf16 hi/lo-split cumsum and bf16 sum-of-exp scan matmul.
    fast=False: f32 everywhere (bit-accurate path for validation).
    """
    B, T, D = x.shape
    H = params["wf"].shape[1]

    Tc = _pick_time_chunk(T, max_time_chunk)
    vmem_cap = _vmem_capacity_bytes()
    Bb = batch_block if batch_block is not None else _pick_batch_block(B, Tc, D, H, vmem_cap)
    assert B % Bb == 0 and T % Tc == 0

    op_dtype = jnp.bfloat16 if fast else jnp.float32
    # Fuse the three projections into one (D, 3H) matmul; bias stays f32.
    w = jnp.concatenate([params["wf"], params["wi"], params["wh"]], axis=1).astype(op_dtype)
    b = jnp.concatenate([params["bf"], params["bi"], params["bh"]],
                        axis=0).reshape(1, 3 * H).astype(jnp.float32)
    # Triangular mask built once on the host side; bf16 is exact for 0/1.
    tri = jnp.tril(jnp.ones((Tc, Tc), op_dtype))

    kernel = functools.partial(minlstm_kernel, fast=fast)

    def build(single_buffer):
        def const(shape):
            if single_buffer:
                # Constant index_map -> fetched once; no need to double-buffer.
                return pl.BlockSpec(shape, lambda bi, ti: (0, 0),
                                    pipeline_mode=pl.Buffered(1))
            return pl.BlockSpec(shape, lambda bi, ti: (0, 0))

        return pl.pallas_call(
            kernel,
            out_shape=jax.ShapeDtypeStruct((B, T, H), x.dtype),
            grid_spec=pltpu.PrefetchScalarGridSpec(
                num_scalar_prefetch=0,
                grid=(B // Bb, T // Tc),
                in_specs=[
                    pl.BlockSpec((Bb, Tc, D), lambda bi, ti: (bi, ti, 0)),   # x chunk
                    pl.BlockSpec((Bb, 1, H), lambda bi, ti: (bi, 0, 0)),     # h_0
                    const((D, 3 * H)),                                       # fused W
                    const((1, 3 * H)),                                       # fused bias
                    const((Tc, Tc)),                                         # tri mask
                ],
                out_specs=pl.BlockSpec((Bb, Tc, H), lambda bi, ti: (bi, ti, 0)),
                scratch_shapes=[pltpu.VMEM((Bb, 1, H), jnp.float32)] * 3,    # A, max, sum carries
            ),
            compiler_params=pltpu.CompilerParams(
                dimension_semantics=("parallel", "arbitrary"),
                vmem_limit_bytes=int(0.65 * vmem_cap),
            ),
        )

    if single_buffer_consts:
        try:
            return build(True)(x, h0, w, b, tri)
        except Exception:
            # pipeline_mode / Buffered(1) unsupported in this jax build:
            # fall back to default double-buffered constants.
            pass
    return build(False)(x, h0, w, b, tri)


def minlstm_reference(x, h0, params):
    """Pure-JAX reference matching the PyTorch forward semantics."""
    sp = jax.nn.softplus
    log_g = lambda z: jnp.where(z >= 0, jnp.log(jax.nn.relu(z) + 0.5), -sp(-z))

    f = x @ params["wf"] + params["bf"]
    i = x @ params["wi"] + params["bi"]
    hh = x @ params["wh"] + params["bh"]

    diff = sp(-f) - sp(-i)
    log_f = -sp(diff)
    log_i = -sp(-diff)
    log_h0 = log_g(h0)
    log_th = log_g(hh)

    log_values = jnp.concatenate([log_h0, log_i + log_th], axis=1)      # (B, T+1, H)
    a_star = jnp.pad(jnp.cumsum(log_f, axis=1), ((0, 0), (1, 0), (0, 0)))
    lcse = lax.cumlogsumexp(log_values - a_star, axis=1)
    log_h = a_star + lcse
    return jnp.exp(log_h)[:, 1:]


def _make_inputs(key, B, T, D, H):
    ks = jax.random.split(key, 8)
    bound = 1.0 / np.sqrt(D)   # nn.Linear default uniform init bound
    params = {
        "wf": jax.random.uniform(ks[0], (D, H), jnp.float32, -bound, bound),
        "bf": jax.random.uniform(ks[1], (H,), jnp.float32, -bound, bound),
        "wi": jax.random.uniform(ks[2], (D, H), jnp.float32, -bound, bound),
        "bi": jax.random.uniform(ks[3], (H,), jnp.float32, -bound, bound),
        "wh": jax.random.uniform(ks[4], (D, H), jnp.float32, -bound, bound),
        "bh": jax.random.uniform(ks[5], (H,), jnp.float32, -bound, bound),
    }
    x = jax.random.normal(ks[6], (B, T, D), jnp.float32)
    h0 = jax.random.normal(ks[7], (B, 1, H), jnp.float32)
    return x, h0, params


if __name__ == "__main__":
    k1, k2, k3 = jax.random.split(jax.random.PRNGKey(0), 3)

    # Case 1: module-sized toy shapes, exact (f32) path, single time chunk.
    x, h0, params = _make_inputs(k1, 2, 8, 16, 32)
    out = jax.block_until_ready(minlstm_forward(x, h0, params, fast=False))
    ref = jax.block_until_ready(minlstm_reference(x, h0, params))
    np.testing.assert_allclose(np.asarray(out), np.asarray(ref), rtol=1e-5, atol=1e-5)

    # Case 2: exercise the chunked scan carry (T=64 in 4 chunks of 16), exact path.
    x2, h02, params2 = _make_inputs(k2, 2, 64, 16, 32)
    out2 = jax.block_until_ready(minlstm_forward(x2, h02, params2,
                                                 max_time_chunk=16, fast=False))
    ref2 = jax.block_until_ready(minlstm_reference(x2, h02, params2))
    np.testing.assert_allclose(np.asarray(out2), np.asarray(ref2), rtol=1e-4, atol=1e-4)

    # Case 3: default fast path (bf16 MXU operands, hi/lo-split cumsum, bf16 scan
    # matmul) over a longer sequence.  Compare against a reference fed the same
    # bf16-rounded operands so the check isolates kernel/scan correctness from
    # operand quantization.
    x3, h03, params3 = _make_inputs(k3, 2, 128, 16, 32)
    out3 = jax.block_until_ready(minlstm_forward(x3, h03, params3, max_time_chunk=32))
    _rb = lambda a: a.astype(jnp.bfloat16).astype(jnp.float32)
    params3_r = {k: (_rb(v) if k.startswith("w") else v) for k, v in params3.items()}
    ref3 = jax.block_until_ready(minlstm_reference(_rb(x3), h03, params3_r))
    np.testing.assert_allclose(np.asarray(out3), np.asarray(ref3), rtol=1e-2, atol=1e-4)

    print("KERNEL_OK")
</pallas_src>

<mosaic_0001>
module attributes {stable_mosaic.version = 11 : i64} {
  func.func @minlstm_kernel(%arg0: i32, %arg1: i32, %arg2: memref<1x8x16xf32, #tpu.memory_space<vmem>>, %arg3: memref<1x1x32xf32, #tpu.memory_space<vmem>>, %arg4: memref<16x96xf32, #tpu.memory_space<vmem>>, %arg5: memref<1x96xf32, #tpu.memory_space<vmem>>, %arg6: memref<8x8xf32, #tpu.memory_space<vmem>>, %arg7: memref<1x8x32xf32, #tpu.memory_space<vmem>>, %arg8: memref<1x1x32xf32, #tpu.memory_space<vmem>>, %arg9: memref<1x1x32xf32, #tpu.memory_space<vmem>>, %arg10: memref<1x1x32xf32, #tpu.memory_space<vmem>>) attributes {dimension_semantics = [#tpu.dimension_semantics<parallel>, #tpu.dimension_semantics<arbitrary>], iteration_bounds = array<i64: 2, 1>, scalar_prefetch = 0 : i64, scratch_operands = 3 : i64, tpu.core_type = #tpu.core_type<tc>, window_params = [{transform_indices = @transform_0, window_bounds = array<i64: 1, 8, 16>}, {transform_indices = @transform_1, window_bounds = array<i64: 1, 1, 32>}, {pipeline_mode = #tpu.pipeline_mode<synchronous>, transform_indices = @transform_2, window_bounds = array<i64: 16, 96>}, {pipeline_mode = #tpu.pipeline_mode<synchronous>, transform_indices = @transform_3, window_bounds = array<i64: 1, 96>}, {pipeline_mode = #tpu.pipeline_mode<synchronous>, transform_indices = @transform_4, window_bounds = array<i64: 8, 8>}, {transform_indices = @transform_5, window_bounds = array<i64: 1, 8, 32>}]} {
    %c0_i32 = arith.constant 0 : i32
    %0 = arith.cmpi eq, %arg1, %c0_i32 : i32
    %1 = arith.extui %0 : i1 to i32
    %c0_i32_0 = arith.constant 0 : i32
    %2 = arith.cmpi ne, %1, %c0_i32_0 : i32
    scf.if %2 {
      %cst_49 = arith.constant 0.000000e+00 : f32
      %132 = vector.broadcast %cst_49 : f32 to vector<1x1x32xf32>
      %c0_50 = arith.constant 0 : index
      %c0_51 = arith.constant 0 : index
      %c0_52 = arith.constant 0 : index
      %133 = vector.load %arg8[%c0_50, %c0_51, %c0_52] : memref<1x1x32xf32, #tpu.memory_space<vmem>>, vector<1x1x32xf32>
      tpu.vector_store %arg8[%c0_50, %c0_51, %c0_52], %132 {strides = array<i32>} : memref<1x1x32xf32, #tpu.memory_space<vmem>>, vector<1x1x32xf32>,
      %c0_53 = arith.constant 0 : index
      %c0_54 = arith.constant 0 : index
      %c0_55 = arith.constant 0 : index
      %134 = vector.load %arg3[%c0_53, %c0_54, %c0_55] : memref<1x1x32xf32, #tpu.memory_space<vmem>>, vector<1x1x32xf32>
      %cst_56 = arith.constant 0.000000e+00 : f32
      %135 = vector.broadcast %cst_56 : f32 to vector<1x1x32xf32>
      %136 = arith.cmpf oge, %134, %135 : vector<1x1x32xf32>
      %cst_57 = arith.constant 0.000000e+00 : f32
      %137 = vector.broadcast %cst_57 : f32 to vector<1x1x32xf32>
      %138 = arith.maximumf %134, %137 : vector<1x1x32xf32>
      %cst_58 = arith.constant 5.000000e-01 : f32
      %139 = vector.broadcast %cst_58 : f32 to vector<1x1x32xf32>
      %140 = arith.addf %138, %139 : vector<1x1x32xf32>
      %141 = math.log %140 : vector<1x1x32xf32>
      %cst_59 = arith.constant 0.000000e+00 : f32
      %142 = vector.broadcast %cst_59 : f32 to vector<1x1x32xf32>
      %143 = arith.subf %142, %134 : vector<1x1x32xf32>
      %cst_60 = arith.constant 0.000000e+00 : f32
      %144 = vector.broadcast %cst_60 : f32 to vector<1x1x32xf32>
      %145 = arith.maximumf %143, %144 : vector<1x1x32xf32>
      %146 = vector.broadcast %cst_60 : f32 to vector<1x1x32xf32>
      %147 = arith.subf %143, %146 : vector<1x1x32xf32>
      %148 = arith.cmpf one, %147, %147 : vector<1x1x32xf32>
      %149 = vector.broadcast %cst_60 : f32 to vector<1x1x32xf32>
      %150 = arith.addf %143, %149 : vector<1x1x32xf32>
      %151 = math.absf %147 : vector<1x1x32xf32>
      %cst_61 = arith.constant 0.000000e+00 : f32
      %152 = vector.broadcast %cst_61 : f32 to vector<1x1x32xf32>
      %153 = arith.subf %152, %151 : vector<1x1x32xf32>
      %154 = math.exp %153 : vector<1x1x32xf32>
      %155 = math.log1p %154 : vector<1x1x32xf32>
      %156 = arith.addf %145, %155 : vector<1x1x32xf32>
      %157 = arith.select %148, %150, %156 : vector<1x1x32xi1>, vector<1x1x32xf32>
      %cst_62 = arith.constant 0.000000e+00 : f32
      %158 = vector.broadcast %cst_62 : f32 to vector<1x1x32xf32>
      %159 = arith.subf %158, %157 : vector<1x1x32xf32>
      %160 = arith.select %136, %141, %159 : vector<1x1x32xi1>, vector<1x1x32xf32>
      %c0_63 = arith.constant 0 : index
      %c0_64 = arith.constant 0 : index
      %c0_65 = arith.constant 0 : index
      %161 = vector.load %arg9[%c0_63, %c0_64, %c0_65] : memref<1x1x32xf32, #tpu.memory_space<vmem>>, vector<1x1x32xf32>
      tpu.vector_store %arg9[%c0_63, %c0_64, %c0_65], %160 {strides = array<i32>} : memref<1x1x32xf32, #tpu.memory_space<vmem>>, vector<1x1x32xf32>,
      %cst_66 = arith.constant 1.000000e+00 : f32
      %162 = vector.broadcast %cst_66 : f32 to vector<1x1x32xf32>
      %c0_67 = arith.constant 0 : index
      %c0_68 = arith.constant 0 : index
      %c0_69 = arith.constant 0 : index
      %163 = vector.load %arg10[%c0_67, %c0_68, %c0_69] : memref<1x1x32xf32, #tpu.memory_space<vmem>>, vector<1x1x32xf32>
      tpu.vector_store %arg10[%c0_67, %c0_68, %c0_69], %162 {strides = array<i32>} : memref<1x1x32xf32, #tpu.memory_space<vmem>>, vector<1x1x32xf32>,
    } else {
    }
    %c0 = arith.constant 0 : index
    %c0_1 = arith.constant 0 : index
    %c0_2 = arith.constant 0 : index
    %3 = vector.load %arg2[%c0, %c0_1, %c0_2] : memref<1x8x16xf32, #tpu.memory_space<vmem>>, vector<1x8x16xf32>
    %4 = vector.shape_cast %3 : vector<1x8x16xf32> to vector<8x16xf32>
    %c0_3 = arith.constant 0 : index
    %c0_4 = arith.constant 0 : index
    %5 = vector.load %arg4[%c0_3, %c0_4] : memref<16x96xf32, #tpu.memory_space<vmem>>, vector<16x96xf32>
    %cst = arith.constant dense<0.000000e+00> : vector<8x96xf32>
    %6 = tpu.matmul %4, %5, %cst {dimension_numbers = #tpu.dot_dimension_numbers<[1], [0], [0], [1], [0, 0, 1, 1], [], []>} : vector<8x16xf32>, vector<16x96xf32>, vector<8x96xf32> -> vector<8x96xf32>
    %c0_5 = arith.constant 0 : index
    %c0_6 = arith.constant 0 : index
    %7 = vector.load %arg5[%c0_5, %c0_6] : memref<1x96xf32, #tpu.memory_space<vmem>>, vector<1x96xf32>
    %8 = vector.broadcast %7 : vector<1x96xf32> to vector<8x96xf32>
    %9 = arith.addf %6, %8 : vector<8x96xf32>
    %10 = vector.extract_strided_slice %9 {offsets = [0, 0], sizes = [8, 32], strides = [1, 1]} : vector<8x96xf32> to vector<8x32xf32>
    %11 = vector.extract_strided_slice %9 {offsets = [0, 32], sizes = [8, 32], strides = [1, 1]} : vector<8x96xf32> to vector<8x32xf32>
    %12 = vector.extract_strided_slice %9 {offsets = [0, 64], sizes = [8, 32], strides = [1, 1]} : vector<8x96xf32> to vector<8x32xf32>
    %cst_7 = arith.constant 0.000000e+00 : f32
    %13 = vector.broadcast %cst_7 : f32 to vector<8x32xf32>
    %14 = arith.subf %13, %10 : vector<8x32xf32>
    %cst_8 = arith.constant 0.000000e+00 : f32
    %15 = vector.broadcast %cst_8 : f32 to vector<8x32xf32>
    %16 = arith.maximumf %14, %15 : vector<8x32xf32>
    %17 = vector.broadcast %cst_8 : f32 to vector<8x32xf32>
    %18 = arith.subf %14, %17 : vector<8x32xf32>
    %19 = arith.cmpf one, %18, %18 : vector<8x32xf32>
    %20 = vector.broadcast %cst_8 : f32 to vector<8x32xf32>
    %21 = arith.addf %14, %20 : vector<8x32xf32>
    %22 = math.absf %18 : vector<8x32xf32>
    %cst_9 = arith.constant 0.000000e+00 : f32
    %23 = vector.broadcast %cst_9 : f32 to vector<8x32xf32>
    %24 = arith.subf %23, %22 : vector<8x32xf32>
    %25 = math.exp %24 : vector<8x32xf32>
    %26 = math.log1p %25 : vector<8x32xf32>
    %27 = arith.addf %16, %26 : vector<8x32xf32>
    %28 = arith.select %19, %21, %27 : vector<8x32xi1>, vector<8x32xf32>
    %cst_10 = arith.constant 0.000000e+00 : f32
    %29 = vector.broadcast %cst_10 : f32 to vector<8x32xf32>
    %30 = arith.subf %29, %11 : vector<8x32xf32>
    %cst_11 = arith.constant 0.000000e+00 : f32
    %31 = vector.broadcast %cst_11 : f32 to vector<8x32xf32>
    %32 = arith.maximumf %30, %31 : vector<8x32xf32>
    %33 = vector.broadcast %cst_11 : f32 to vector<8x32xf32>
    %34 = arith.subf %30, %33 : vector<8x32xf32>
    %35 = arith.cmpf one, %34, %34 : vector<8x32xf32>
    %36 = vector.broadcast %cst_11 : f32 to vector<8x32xf32>
    %37 = arith.addf %30, %36 : vector<8x32xf32>
    %38 = math.absf %34 : vector<8x32xf32>
    %cst_12 = arith.constant 0.000000e+00 : f32
    %39 = vector.broadcast %cst_12 : f32 to vector<8x32xf32>
    %40 = arith.subf %39, %38 : vector<8x32xf32>
    %41 = math.exp %40 : vector<8x32xf32>
    %42 = math.log1p %41 : vector<8x32xf32>
    %43 = arith.addf %32, %42 : vector<8x32xf32>
    %44 = arith.select %35, %37, %43 : vector<8x32xi1>, vector<8x32xf32>
    %45 = arith.subf %28, %44 : vector<8x32xf32>
    %cst_13 = arith.constant 0.000000e+00 : f32
    %46 = vector.broadcast %cst_13 : f32 to vector<8x32xf32>
    %47 = arith.maximumf %45, %46 : vector<8x32xf32>
    %48 = vector.broadcast %cst_13 : f32 to vector<8x32xf32>
    %49 = arith.subf %45, %48 : vector<8x32xf32>
    %50 = arith.cmpf one, %49, %49 : vector<8x32xf32>
    %51 = vector.broadcast %cst_13 : f32 to vector<8x32xf32>
    %52 = arith.addf %45, %51 : vector<8x32xf32>
    %53 = math.absf %49 : vector<8x32xf32>
    %cst_14 = arith.constant 0.000000e+00 : f32
    %54 = vector.broadcast %cst_14 : f32 to vector<8x32xf32>
    %55 = arith.subf %54, %53 : vector<8x32xf32>
    %56 = math.exp %55 : vector<8x32xf32>
    %57 = math.log1p %56 : vector<8x32xf32>
    %58 = arith.addf %47, %57 : vector<8x32xf32>
    %59 = arith.select %50, %52, %58 : vector<8x32xi1>, vector<8x32xf32>
    %cst_15 = arith.constant 0.000000e+00 : f32
    %60 = vector.broadcast %cst_15 : f32 to vector<8x32xf32>
    %61 = arith.subf %60, %59 : vector<8x32xf32>
    %62 = arith.subf %45, %59 : vector<8x32xf32>
    %cst_16 = arith.constant 0.000000e+00 : f32
    %63 = vector.broadcast %cst_16 : f32 to vector<8x32xf32>
    %64 = arith.cmpf oge, %12, %63 : vector<8x32xf32>
    %cst_17 = arith.constant 0.000000e+00 : f32
    %65 = vector.broadcast %cst_17 : f32 to vector<8x32xf32>
    %66 = arith.maximumf %12, %65 : vector<8x32xf32>
    %cst_18 = arith.constant 5.000000e-01 : f32
    %67 = vector.broadcast %cst_18 : f32 to vector<8x32xf32>
    %68 = arith.addf %66, %67 : vector<8x32xf32>
    %69 = math.log %68 : vector<8x32xf32>
    %cst_19 = arith.constant 0.000000e+00 : f32
    %70 = vector.broadcast %cst_19 : f32 to vector<8x32xf32>
    %71 = arith.subf %70, %12 : vector<8x32xf32>
    %cst_20 = arith.constant 0.000000e+00 : f32
    %72 = vector.broadcast %cst_20 : f32 to vector<8x32xf32>
    %73 = arith.maximumf %71, %72 : vector<8x32xf32>
    %74 = vector.broadcast %cst_20 : f32 to vector<8x32xf32>
    %75 = arith.subf %71, %74 : vector<8x32xf32>
    %76 = arith.cmpf one, %75, %75 : vector<8x32xf32>
    %77 = vector.broadcast %cst_20 : f32 to vector<8x32xf32>
    %78 = arith.addf %71, %77 : vector<8x32xf32>
    %79 = math.absf %75 : vector<8x32xf32>
    %cst_21 = arith.constant 0.000000e+00 : f32
    %80 = vector.broadcast %cst_21 : f32 to vector<8x32xf32>
    %81 = arith.subf %80, %79 : vector<8x32xf32>
    %82 = math.exp %81 : vector<8x32xf32>
    %83 = math.log1p %82 : vector<8x32xf32>
    %84 = arith.addf %73, %83 : vector<8x32xf32>
    %85 = arith.select %76, %78, %84 : vector<8x32xi1>, vector<8x32xf32>
    %cst_22 = arith.constant 0.000000e+00 : f32
    %86 = vector.broadcast %cst_22 : f32 to vector<8x32xf32>
    %87 = arith.subf %86, %85 : vector<8x32xf32>
    %88 = arith.select %64, %69, %87 : vector<8x32xi1>, vector<8x32xf32>
    %89 = arith.addf %62, %88 : vector<8x32xf32>
    %c0_23 = arith.constant 0 : index
    %c0_24 = arith.constant 0 : index
    %90 = vector.load %arg6[%c0_23, %c0_24] : memref<8x8xf32, #tpu.memory_space<vmem>>, vector<8x8xf32>
    %cst_25 = arith.constant dense<0.000000e+00> : vector<8x32xf32>
    %91 = tpu.matmul %90, %61, %cst_25 {dimension_numbers = #tpu.dot_dimension_numbers<[1], [0], [0], [1], [0, 0, 1, 1], [], []>} : vector<8x8xf32>, vector<8x32xf32>, vector<8x32xf32> -> vector<8x32xf32>
    %c0_26 = arith.constant 0 : index
    %c0_27 = arith.constant 0 : index
    %c0_28 = arith.constant 0 : index
    %92 = vector.load %arg8[%c0_26, %c0_27, %c0_28] : memref<1x1x32xf32, #tpu.memory_space<vmem>>, vector<1x1x32xf32>
    %93 = vector.shape_cast %92 : vector<1x1x32xf32> to vector<1x32xf32>
    %94 = vector.broadcast %93 : vector<1x32xf32> to vector<8x32xf32>
    %95 = arith.addf %94, %91 : vector<8x32xf32>
    %96 = arith.subf %89, %95 : vector<8x32xf32>
    %c0_29 = arith.constant 0 : index
    %c0_30 = arith.constant 0 : index
    %c0_31 = arith.constant 0 : index
    %97 = vector.load %arg9[%c0_29, %c0_30, %c0_31] : memref<1x1x32xf32, #tpu.memory_space<vmem>>, vector<1x1x32xf32>
    %98 = vector.shape_cast %97 : vector<1x1x32xf32> to vector<1x32xf32>
    %cst_32 = arith.constant dense<0xFF800000> : vector<32xf32>
    %99 = vector.multi_reduction <maximumf>, %96, %cst_32 [0] : vector<8x32xf32> to vector<32xf32>
    %100 = vector.shape_cast %99 : vector<32xf32> to vector<1x32xf32>
    %101 = arith.maximumf %98, %100 : vector<1x32xf32>
    %c0_33 = arith.constant 0 : index
    %c0_34 = arith.constant 0 : index
    %c0_35 = arith.constant 0 : index
    %102 = vector.load %arg10[%c0_33, %c0_34, %c0_35] : memref<1x1x32xf32, #tpu.memory_space<vmem>>, vector<1x1x32xf32>
    %103 = vector.shape_cast %102 : vector<1x1x32xf32> to vector<1x32xf32>
    %104 = arith.subf %98, %101 : vector<1x32xf32>
    %105 = math.exp %104 : vector<1x32xf32>
    %106 = arith.mulf %103, %105 : vector<1x32xf32>
    %107 = vector.broadcast %101 : vector<1x32xf32> to vector<8x32xf32>
    %108 = arith.subf %96, %107 : vector<8x32xf32>
    %109 = math.exp %108 : vector<8x32xf32>
    %cst_36 = arith.constant dense<0.000000e+00> : vector<8x32xf32>
    %110 = tpu.matmul %90, %109, %cst_36 {dimension_numbers = #tpu.dot_dimension_numbers<[1], [0], [0], [1], [0, 0, 1, 1], [], []>} : vector<8x8xf32>, vector<8x32xf32>, vector<8x32xf32> -> vector<8x32xf32>
    %111 = vector.broadcast %106 : vector<1x32xf32> to vector<8x32xf32>
    %112 = arith.addf %111, %110 : vector<8x32xf32>
    %113 = vector.broadcast %101 : vector<1x32xf32> to vector<8x32xf32>
    %114 = arith.addf %95, %113 : vector<8x32xf32>
    %115 = math.log %112 : vector<8x32xf32>
    %116 = arith.addf %114, %115 : vector<8x32xf32>
    %117 = math.exp %116 : vector<8x32xf32>
    %c0_37 = arith.constant 0 : index
    %c0_38 = arith.constant 0 : index
    %c0_39 = arith.constant 0 : index
    %118 = vector.load %arg7[%c0_37, %c0_38, %c0_39] : memref<1x8x32xf32, #tpu.memory_space<vmem>>, vector<1x8x32xf32>
    %119 = vector.shape_cast %118 : vector<1x8x32xf32> to vector<8x32xf32>
    %120 = vector.shape_cast %117 : vector<8x32xf32> to vector<1x8x32xf32>
    tpu.vector_store %arg7[%c0_37, %c0_38, %c0_39], %120 {strides = array<i32>} : memref<1x8x32xf32, #tpu.memory_space<vmem>>, vector<1x8x32xf32>,
    %121 = vector.extract_strided_slice %95 {offsets = [7, 0], sizes = [1, 32], strides = [1, 1]} : vector<8x32xf32> to vector<1x32xf32>
    %c0_40 = arith.constant 0 : index
    %c0_41 = arith.constant 0 : index
    %c0_42 = arith.constant 0 : index
    %122 = vector.load %arg8[%c0_40, %c0_41, %c0_42] : memref<1x1x32xf32, #tpu.memory_space<vmem>>, vector<1x1x32xf32>
    %123 = vector.shape_cast %122 : vector<1x1x32xf32> to vector<1x32xf32>
    %124 = vector.shape_cast %121 : vector<1x32xf32> to vector<1x1x32xf32>
    tpu.vector_store %arg8[%c0_40, %c0_41, %c0_42], %124 {strides = array<i32>} : memref<1x1x32xf32, #tpu.memory_space<vmem>>, vector<1x1x32xf32>,
    %c0_43 = arith.constant 0 : index
    %c0_44 = arith.constant 0 : index
    %c0_45 = arith.constant 0 : index
    %125 = vector.load %arg9[%c0_43, %c0_44, %c0_45] : memref<1x1x32xf32, #tpu.memory_space<vmem>>, vector<1x1x32xf32>
    %126 = vector.shape_cast %125 : vector<1x1x32xf32> to vector<1x32xf32>
    %127 = vector.shape_cast %101 : vector<1x32xf32> to vector<1x1x32xf32>
    tpu.vector_store %arg9[%c0_43, %c0_44, %c0_45], %127 {strides = array<i32>} : memref<1x1x32xf32, #tpu.memory_space<vmem>>, vector<1x1x32xf32>,
    %128 = vector.extract_strided_slice %112 {offsets = [7, 0], sizes = [1, 32], strides = [1, 1]} : vector<8x32xf32> to vector<1x32xf32>
    %c0_46 = arith.constant 0 : index
    %c0_47 = arith.constant 0 : index
    %c0_48 = arith.constant 0 : index
    %129 = vector.load %arg10[%c0_46, %c0_47, %c0_48] : memref<1x1x32xf32, #tpu.memory_space<vmem>>, vector<1x1x32xf32>
    %130 = vector.shape_cast %129 : vector<1x1x32xf32> to vector<1x32xf32>
    %131 = vector.shape_cast %128 : vector<1x32xf32> to vector<1x1x32xf32>
    tpu.vector_store %arg10[%c0_46, %c0_47, %c0_48], %131 {strides = array<i32>} : memref<1x1x32xf32, #tpu.memory_space<vmem>>, vector<1x1x32xf32>,
    return
  }
  func.func @transform_0(%arg0: i32, %arg1: i32) -> (i32, i32, i32) {
    %c0_i32 = arith.constant 0 : i32
    %c0_i32_0 = arith.constant 0 : i32
    return %arg0, %arg1, %c0_i32 : i32, i32, i32
  }
  func.func @transform_1(%arg0: i32, %arg1: i32) -> (i32, i32, i32) {
    %c0_i32 = arith.constant 0 : i32
    %c0_i32_0 = arith.constant 0 : i32
    %c0_i32_1 = arith.constant 0 : i32
    return %arg0, %c0_i32, %c0_i32_0 : i32, i32, i32
  }
  func.func @transform_2(%arg0: i32, %arg1: i32) -> (i32, i32) {
    %c0_i32 = arith.constant 0 : i32
    %c0_i32_0 = arith.constant 0 : i32
    %c0_i32_1 = arith.constant 0 : i32
    return %c0_i32, %c0_i32_0 : i32, i32
  }
  func.func @transform_3(%arg0: i32, %arg1: i32) -> (i32, i32) {
    %c0_i32 = arith.constant 0 : i32
    %c0_i32_0 = arith.constant 0 : i32
    %c0_i32_1 = arith.constant 0 : i32
    return %c0_i32, %c0_i32_0 : i32, i32
  }
  func.func @transform_4(%arg0: i32, %arg1: i32) -> (i32, i32) {
    %c0_i32 = arith.constant 0 : i32
    %c0_i32_0 = arith.constant 0 : i32
    %c0_i32_1 = arith.constant 0 : i32
    return %c0_i32, %c0_i32_0 : i32, i32
  }
  func.func @transform_5(%arg0: i32, %arg1: i32) -> (i32, i32, i32) {
    %c0_i32 = arith.constant 0 : i32
    %c0_i32_0 = arith.constant 0 : i32
    return %arg0, %arg1, %c0_i32 : i32, i32, i32
  }
}

module attributes {stable_mosaic.version = 11 : i64} {
  func.func @minlstm_kernel(%arg0: i32, %arg1: i32, %arg2: memref<1x8x16xf32, #tpu.memory_space<vmem>>, %arg3: memref<1x1x32xf32, #tpu.memory_space<vmem>>, %arg4: memref<16x96xf32, #tpu.memory_space<vmem>>, %arg5: memref<1x96xf32, #tpu.memory_space<vmem>>, %arg6: memref<8x8xf32, #tpu.memory_space<vmem>>, %arg7: memref<1x8x32xf32, #tpu.memory_space<vmem>>, %arg8: memref<1x1x32xf32, #tpu.memory_space<vmem>>, %arg9: memref<1x1x32xf32, #tpu.memory_space<vmem>>, %arg10: memref<1x1x32xf32, #tpu.memory_space<vmem>>) attributes {dimension_semantics = [#tpu.dimension_semantics<parallel>, #tpu.dimension_semantics<arbitrary>], iteration_bounds = array<i64: 2, 1>, scalar_prefetch = 0 : i64, scratch_operands = 3 : i64, tpu.core_type = #tpu.core_type<tc>, window_params = [{transform_indices = @transform_0, window_bounds = array<i64: 1, 8, 16>}, {transform_indices = @transform_1, window_bounds = array<i64: 1, 1, 32>}, {pipeline_mode = #tpu.pipeline_mode<synchronous>, transform_indices = @transform_2, window_bounds = array<i64: 16, 96>}, {pipeline_mode = #tpu.pipeline_mode<synchronous>, transform_indices = @transform_3, window_bounds = array<i64: 1, 96>}, {pipeline_mode = #tpu.pipeline_mode<synchronous>, transform_indices = @transform_4, window_bounds = array<i64: 8, 8>}, {transform_indices = @transform_5, window_bounds = array<i64: 1, 8, 32>}]} {
    %c0_i32 = arith.constant 0 : i32
    %0 = arith.cmpi eq, %arg1, %c0_i32 : i32
    %1 = arith.extui %0 : i1 to i32
    %c0_i32_0 = arith.constant 0 : i32
    %2 = arith.cmpi ne, %1, %c0_i32_0 : i32
    scf.if %2 {
      %cst_49 = arith.constant 0.000000e+00 : f32
      %132 = vector.broadcast %cst_49 : f32 to vector<1x1x32xf32>
      %c0_50 = arith.constant 0 : index
      %c0_51 = arith.constant 0 : index
      %c0_52 = arith.constant 0 : index
      %133 = vector.load %arg8[%c0_50, %c0_51, %c0_52] : memref<1x1x32xf32, #tpu.memory_space<vmem>>, vector<1x1x32xf32>
      tpu.vector_store %arg8[%c0_50, %c0_51, %c0_52], %132 {strides = array<i32>} : memref<1x1x32xf32, #tpu.memory_space<vmem>>, vector<1x1x32xf32>,
      %c0_53 = arith.constant 0 : index
      %c0_54 = arith.constant 0 : index
      %c0_55 = arith.constant 0 : index
      %134 = vector.load %arg3[%c0_53, %c0_54, %c0_55] : memref<1x1x32xf32, #tpu.memory_space<vmem>>, vector<1x1x32xf32>
      %cst_56 = arith.constant 0.000000e+00 : f32
      %135 = vector.broadcast %cst_56 : f32 to vector<1x1x32xf32>
      %136 = arith.cmpf oge, %134, %135 : vector<1x1x32xf32>
      %cst_57 = arith.constant 0.000000e+00 : f32
      %137 = vector.broadcast %cst_57 : f32 to vector<1x1x32xf32>
      %138 = arith.maximumf %134, %137 : vector<1x1x32xf32>
      %cst_58 = arith.constant 5.000000e-01 : f32
      %139 = vector.broadcast %cst_58 : f32 to vector<1x1x32xf32>
      %140 = arith.addf %138, %139 : vector<1x1x32xf32>
      %141 = math.log %140 : vector<1x1x32xf32>
      %cst_59 = arith.constant 0.000000e+00 : f32
      %142 = vector.broadcast %cst_59 : f32 to vector<1x1x32xf32>
      %143 = arith.subf %142, %134 : vector<1x1x32xf32>
      %cst_60 = arith.constant 0.000000e+00 : f32
      %144 = vector.broadcast %cst_60 : f32 to vector<1x1x32xf32>
      %145 = arith.maximumf %143, %144 : vector<1x1x32xf32>
      %146 = vector.broadcast %cst_60 : f32 to vector<1x1x32xf32>
      %147 = arith.subf %143, %146 : vector<1x1x32xf32>
      %148 = arith.cmpf one, %147, %147 : vector<1x1x32xf32>
      %149 = vector.broadcast %cst_60 : f32 to vector<1x1x32xf32>
      %150 = arith.addf %143, %149 : vector<1x1x32xf32>
      %151 = math.absf %147 : vector<1x1x32xf32>
      %cst_61 = arith.constant 0.000000e+00 : f32
      %152 = vector.broadcast %cst_61 : f32 to vector<1x1x32xf32>
      %153 = arith.subf %152, %151 : vector<1x1x32xf32>
      %154 = math.exp %153 : vector<1x1x32xf32>
      %155 = math.log1p %154 : vector<1x1x32xf32>
      %156 = arith.addf %145, %155 : vector<1x1x32xf32>
      %157 = arith.select %148, %150, %156 : vector<1x1x32xi1>, vector<1x1x32xf32>
      %cst_62 = arith.constant 0.000000e+00 : f32
      %158 = vector.broadcast %cst_62 : f32 to vector<1x1x32xf32>
      %159 = arith.subf %158, %157 : vector<1x1x32xf32>
      %160 = arith.select %136, %141, %159 : vector<1x1x32xi1>, vector<1x1x32xf32>
      %c0_63 = arith.constant 0 : index
      %c0_64 = arith.constant 0 : index
      %c0_65 = arith.constant 0 : index
      %161 = vector.load %arg9[%c0_63, %c0_64, %c0_65] : memref<1x1x32xf32, #tpu.memory_space<vmem>>, vector<1x1x32xf32>
      tpu.vector_store %arg9[%c0_63, %c0_64, %c0_65], %160 {strides = array<i32>} : memref<1x1x32xf32, #tpu.memory_space<vmem>>, vector<1x1x32xf32>,
      %cst_66 = arith.constant 1.000000e+00 : f32
      %162 = vector.broadcast %cst_66 : f32 to vector<1x1x32xf32>
      %c0_67 = arith.constant 0 : index
      %c0_68 = arith.constant 0 : index
      %c0_69 = arith.constant 0 : index
      %163 = vector.load %arg10[%c0_67, %c0_68, %c0_69] : memref<1x1x32xf32, #tpu.memory_space<vmem>>, vector<1x1x32xf32>
      tpu.vector_store %arg10[%c0_67, %c0_68, %c0_69], %162 {strides = array<i32>} : memref<1x1x32xf32, #tpu.memory_space<vmem>>, vector<1x1x32xf32>,
    } else {
    }
    %c0 = arith.constant 0 : index
    %c0_1 = arith.constant 0 : index
    %c0_2 = arith.constant 0 : index
    %3 = vector.load %arg2[%c0, %c0_1, %c0_2] : memref<1x8x16xf32, #tpu.memory_space<vmem>>, vector<1x8x16xf32>
    %4 = vector.shape_cast %3 : vector<1x8x16xf32> to vector<8x16xf32>
    %c0_3 = arith.constant 0 : index
    %c0_4 = arith.constant 0 : index
    %5 = vector.load %arg4[%c0_3, %c0_4] : memref<16x96xf32, #tpu.memory_space<vmem>>, vector<16x96xf32>
    %cst = arith.constant dense<0.000000e+00> : vector<8x96xf32>
    %6 = tpu.matmul %4, %5, %cst {dimension_numbers = #tpu.dot_dimension_numbers<[1], [0], [0], [1], [0, 0, 1, 1], [], []>} : vector<8x16xf32>, vector<16x96xf32>, vector<8x96xf32> -> vector<8x96xf32>
    %c0_5 = arith.constant 0 : index
    %c0_6 = arith.constant 0 : index
    %7 = vector.load %arg5[%c0_5, %c0_6] : memref<1x96xf32, #tpu.memory_space<vmem>>, vector<1x96xf32>
    %8 = vector.broadcast %7 : vector<1x96xf32> to vector<8x96xf32>
    %9 = arith.addf %6, %8 : vector<8x96xf32>
    %10 = vector.extract_strided_slice %9 {offsets = [0, 0], sizes = [8, 32], strides = [1, 1]} : vector<8x96xf32> to vector<8x32xf32>
    %11 = vector.extract_strided_slice %9 {offsets = [0, 32], sizes = [8, 32], strides = [1, 1]} : vector<8x96xf32> to vector<8x32xf32>
    %12 = vector.extract_strided_slice %9 {offsets = [0, 64], sizes = [8, 32], strides = [1, 1]} : vector<8x96xf32> to vector<8x32xf32>
    %cst_7 = arith.constant 0.000000e+00 : f32
    %13 = vector.broadcast %cst_7 : f32 to vector<8x32xf32>
    %14 = arith.subf %13, %10 : vector<8x32xf32>
    %cst_8 = arith.constant 0.000000e+00 : f32
    %15 = vector.broadcast %cst_8 : f32 to vector<8x32xf32>
    %16 = arith.maximumf %14, %15 : vector<8x32xf32>
    %17 = vector.broadcast %cst_8 : f32 to vector<8x32xf32>
    %18 = arith.subf %14, %17 : vector<8x32xf32>
    %19 = arith.cmpf one, %18, %18 : vector<8x32xf32>
    %20 = vector.broadcast %cst_8 : f32 to vector<8x32xf32>
    %21 = arith.addf %14, %20 : vector<8x32xf32>
    %22 = math.absf %18 : vector<8x32xf32>
    %cst_9 = arith.constant 0.000000e+00 : f32
    %23 = vector.broadcast %cst_9 : f32 to vector<8x32xf32>
    %24 = arith.subf %23, %22 : vector<8x32xf32>
    %25 = math.exp %24 : vector<8x32xf32>
    %26 = math.log1p %25 : vector<8x32xf32>
    %27 = arith.addf %16, %26 : vector<8x32xf32>
    %28 = arith.select %19, %21, %27 : vector<8x32xi1>, vector<8x32xf32>
    %cst_10 = arith.constant 0.000000e+00 : f32
    %29 = vector.broadcast %cst_10 : f32 to vector<8x32xf32>
    %30 = arith.subf %29, %11 : vector<8x32xf32>
    %cst_11 = arith.constant 0.000000e+00 : f32
    %31 = vector.broadcast %cst_11 : f32 to vector<8x32xf32>
    %32 = arith.maximumf %30, %31 : vector<8x32xf32>
    %33 = vector.broadcast %cst_11 : f32 to vector<8x32xf32>
    %34 = arith.subf %30, %33 : vector<8x32xf32>
    %35 = arith.cmpf one, %34, %34 : vector<8x32xf32>
    %36 = vector.broadcast %cst_11 : f32 to vector<8x32xf32>
    %37 = arith.addf %30, %36 : vector<8x32xf32>
    %38 = math.absf %34 : vector<8x32xf32>
    %cst_12 = arith.constant 0.000000e+00 : f32
    %39 = vector.broadcast %cst_12 : f32 to vector<8x32xf32>
    %40 = arith.subf %39, %38 : vector<8x32xf32>
    %41 = math.exp %40 : vector<8x32xf32>
    %42 = math.log1p %41 : vector<8x32xf32>
    %43 = arith.addf %32, %42 : vector<8x32xf32>
    %44 = arith.select %35, %37, %43 : vector<8x32xi1>, vector<8x32xf32>
    %45 = arith.subf %28, %44 : vector<8x32xf32>
    %cst_13 = arith.constant 0.000000e+00 : f32
    %46 = vector.broadcast %cst_13 : f32 to vector<8x32xf32>
    %47 = arith.maximumf %45, %46 : vector<8x32xf32>
    %48 = vector.broadcast %cst_13 : f32 to vector<8x32xf32>
    %49 = arith.subf %45, %48 : vector<8x32xf32>
    %50 = arith.cmpf one, %49, %49 : vector<8x32xf32>
    %51 = vector.broadcast %cst_13 : f32 to vector<8x32xf32>
    %52 = arith.addf %45, %51 : vector<8x32xf32>
    %53 = math.absf %49 : vector<8x32xf32>
    %cst_14 = arith.constant 0.000000e+00 : f32
    %54 = vector.broadcast %cst_14 : f32 to vector<8x32xf32>
    %55 = arith.subf %54, %53 : vector<8x32xf32>
    %56 = math.exp %55 : vector<8x32xf32>
    %57 = math.log1p %56 : vector<8x32xf32>
    %58 = arith.addf %47, %57 : vector<8x32xf32>
    %59 = arith.select %50, %52, %58 : vector<8x32xi1>, vector<8x32xf32>
    %cst_15 = arith.constant 0.000000e+00 : f32
    %60 = vector.broadcast %cst_15 : f32 to vector<8x32xf32>
    %61 = arith.subf %60, %59 : vector<8x32xf32>
    %62 = arith.subf %45, %59 : vector<8x32xf32>
    %cst_16 = arith.constant 0.000000e+00 : f32
    %63 = vector.broadcast %cst_16 : f32 to vector<8x32xf32>
    %64 = arith.cmpf oge, %12, %63 : vector<8x32xf32>
    %cst_17 = arith.constant 0.000000e+00 : f32
    %65 = vector.broadcast %cst_17 : f32 to vector<8x32xf32>
    %66 = arith.maximumf %12, %65 : vector<8x32xf32>
    %cst_18 = arith.constant 5.000000e-01 : f32
    %67 = vector.broadcast %cst_18 : f32 to vector<8x32xf32>
    %68 = arith.addf %66, %67 : vector<8x32xf32>
    %69 = math.log %68 : vector<8x32xf32>
    %cst_19 = arith.constant 0.000000e+00 : f32
    %70 = vector.broadcast %cst_19 : f32 to vector<8x32xf32>
    %71 = arith.subf %70, %12 : vector<8x32xf32>
    %cst_20 = arith.constant 0.000000e+00 : f32
    %72 = vector.broadcast %cst_20 : f32 to vector<8x32xf32>
    %73 = arith.maximumf %71, %72 : vector<8x32xf32>
    %74 = vector.broadcast %cst_20 : f32 to vector<8x32xf32>
    %75 = arith.subf %71, %74 : vector<8x32xf32>
    %76 = arith.cmpf one, %75, %75 : vector<8x32xf32>
    %77 = vector.broadcast %cst_20 : f32 to vector<8x32xf32>
    %78 = arith.addf %71, %77 : vector<8x32xf32>
    %79 = math.absf %75 : vector<8x32xf32>
    %cst_21 = arith.constant 0.000000e+00 : f32
    %80 = vector.broadcast %cst_21 : f32 to vector<8x32xf32>
    %81 = arith.subf %80, %79 : vector<8x32xf32>
    %82 = math.exp %81 : vector<8x32xf32>
    %83 = math.log1p %82 : vector<8x32xf32>
    %84 = arith.addf %73, %83 : vector<8x32xf32>
    %85 = arith.select %76, %78, %84 : vector<8x32xi1>, vector<8x32xf32>
    %cst_22 = arith.constant 0.000000e+00 : f32
    %86 = vector.broadcast %cst_22 : f32 to vector<8x32xf32>
    %87 = arith.subf %86, %85 : vector<8x32xf32>
    %88 = arith.select %64, %69, %87 : vector<8x32xi1>, vector<8x32xf32>
    %89 = arith.addf %62, %88 : vector<8x32xf32>
    %c0_23 = arith.constant 0 : index
    %c0_24 = arith.constant 0 : index
    %90 = vector.load %arg6[%c0_23, %c0_24] : memref<8x8xf32, #tpu.memory_space<vmem>>, vector<8x8xf32>
    %cst_25 = arith.constant dense<0.000000e+00> : vector<8x32xf32>
    %91 = tpu.matmul %90, %61, %cst_25 {dimension_numbers = #tpu.dot_dimension_numbers<[1], [0], [0], [1], [0, 0, 1, 1], [], []>} : vector<8x8xf32>, vector<8x32xf32>, vector<8x32xf32> -> vector<8x32xf32>
    %c0_26 = arith.constant 0 : index
    %c0_27 = arith.constant 0 : index
    %c0_28 = arith.constant 0 : index
    %92 = vector.load %arg8[%c0_26, %c0_27, %c0_28] : memref<1x1x32xf32, #tpu.memory_space<vmem>>, vector<1x1x32xf32>
    %93 = vector.shape_cast %92 : vector<1x1x32xf32> to vector<1x32xf32>
    %94 = vector.broadcast %93 : vector<1x32xf32> to vector<8x32xf32>
    %95 = arith.addf %94, %91 : vector<8x32xf32>
    %96 = arith.subf %89, %95 : vector<8x32xf32>
    %c0_29 = arith.constant 0 : index
    %c0_30 = arith.constant 0 : index
    %c0_31 = arith.constant 0 : index
    %97 = vector.load %arg9[%c0_29, %c0_30, %c0_31] : memref<1x1x32xf32, #tpu.memory_space<vmem>>, vector<1x1x32xf32>
    %98 = vector.shape_cast %97 : vector<1x1x32xf32> to vector<1x32xf32>
    %cst_32 = arith.constant dense<0xFF800000> : vector<32xf32>
    %99 = vector.multi_reduction <maximumf>, %96, %cst_32 [0] : vector<8x32xf32> to vector<32xf32>
    %100 = vector.shape_cast %99 : vector<32xf32> to vector<1x32xf32>
    %101 = arith.maximumf %98, %100 : vector<1x32xf32>
    %c0_33 = arith.constant 0 : index
    %c0_34 = arith.constant 0 : index
    %c0_35 = arith.constant 0 : index
    %102 = vector.load %arg10[%c0_33, %c0_34, %c0_35] : memref<1x1x32xf32, #tpu.memory_space<vmem>>, vector<1x1x32xf32>
    %103 = vector.shape_cast %102 : vector<1x1x32xf32> to vector<1x32xf32>
    %104 = arith.subf %98, %101 : vector<1x32xf32>
    %105 = math.exp %104 : vector<1x32xf32>
    %106 = arith.mulf %103, %105 : vector<1x32xf32>
    %107 = vector.broadcast %101 : vector<1x32xf32> to vector<8x32xf32>
    %108 = arith.subf %96, %107 : vector<8x32xf32>
    %109 = math.exp %108 : vector<8x32xf32>
    %cst_36 = arith.constant dense<0.000000e+00> : vector<8x32xf32>
    %110 = tpu.matmul %90, %109, %cst_36 {dimension_numbers = #tpu.dot_dimension_numbers<[1], [0], [0], [1], [0, 0, 1, 1], [], []>} : vector<8x8xf32>, vector<8x32xf32>, vector<8x32xf32> -> vector<8x32xf32>
    %111 = vector.broadcast %106 : vector<1x32xf32> to vector<8x32xf32>
    %112 = arith.addf %111, %110 : vector<8x32xf32>
    %113 = vector.broadcast %101 : vector<1x32xf32> to vector<8x32xf32>
    %114 = arith.addf %95, %113 : vector<8x32xf32>
    %115 = math.log %112 : vector<8x32xf32>
    %116 = arith.addf %114, %115 : vector<8x32xf32>
    %117 = math.exp %116 : vector<8x32xf32>
    %c0_37 = arith.constant 0 : index
    %c0_38 = arith.constant 0 : index
    %c0_39 = arith.constant 0 : index
    %118 = vector.load %arg7[%c0_37, %c0_38, %c0_39] : memref<1x8x32xf32, #tpu.memory_space<vmem>>, vector<1x8x32xf32>
    %119 = vector.shape_cast %118 : vector<1x8x32xf32> to vector<8x32xf32>
    %120 = vector.shape_cast %117 : vector<8x32xf32> to vector<1x8x32xf32>
    tpu.vector_store %arg7[%c0_37, %c0_38, %c0_39], %120 {strides = array<i32>} : memref<1x8x32xf32, #tpu.memory_space<vmem>>, vector<1x8x32xf32>,
    %121 = vector.extract_strided_slice %95 {offsets = [7, 0], sizes = [1, 32], strides = [1, 1]} : vector<8x32xf32> to vector<1x32xf32>
    %c0_40 = arith.constant 0 : index
    %c0_41 = arith.constant 0 : index
    %c0_42 = arith.constant 0 : index
    %122 = vector.load %arg8[%c0_40, %c0_41, %c0_42] : memref<1x1x32xf32, #tpu.memory_space<vmem>>, vector<1x1x32xf32>
    %123 = vector.shape_cast %122 : vector<1x1x32xf32> to vector<1x32xf32>
    %124 = vector.shape_cast %121 : vector<1x32xf32> to vector<1x1x32xf32>
    tpu.vector_store %arg8[%c0_40, %c0_41, %c0_42], %124 {strides = array<i32>} : memref<1x1x32xf32, #tpu.memory_space<vmem>>, vector<1x1x32xf32>,
    %c0_43 = arith.constant 0 : index
    %c0_44 = arith.constant 0 : index
    %c0_45 = arith.constant 0 : index
    %125 = vector.load %arg9[%c0_43, %c0_44, %c0_45] : memref<1x1x32xf32, #tpu.memory_space<vmem>>, vector<1x1x32xf32>
    %126 = vector.shape_cast %125 : vector<1x1x32xf32> to vector<1x32xf32>
    %127 = vector.shape_cast %101 : vector<1x32xf32> to vector<1x1x32xf32>
    tpu.vector_store %arg9[%c0_43, %c0_44, %c0_45], %127 {strides = array<i32>} : memref<1x1x32xf32, #tpu.memory_space<vmem>>, vector<1x1x32xf32>,
    %128 = vector.extract_strided_slice %112 {offsets = [7, 0], sizes = [1, 32], strides = [1, 1]} : vector<8x32xf32> to vector<1x32xf32>
    %c0_46 = arith.constant 0 : index
    %c0_47 = arith.constant 0 : index
    %c0_48 = arith.constant 0 : index
    %129 = vector.load %arg10[%c0_46, %c0_47, %c0_48] : memref<1x1x32xf32, #tpu.memory_space<vmem>>, vector<1x1x32xf32>
    %130 = vector.shape_cast %129 : vector<1x1x32xf32> to vector<1x32xf32>
    %131 = vector.shape_cast %128 : vector<1x32xf32> to vector<1x1x32xf32>
    tpu.vector_store %arg10[%c0_46, %c0_47, %c0_48], %131 {strides = array<i32>} : memref<1x1x32xf32, #tpu.memory_space<vmem>>, vector<1x1x32xf32>,
    return
  }
  func.func @transform_0(%arg0: i32, %arg1: i32) -> (i32, i32, i32) {
    %c0_i32 = arith.constant 0 : i32
    %c0_i32_0 = arith.constant 0 : i32
    return %arg0, %arg1, %c0_i32 : i32, i32, i32
  }
  func.func @transform_1(%arg0: i32, %arg1: i32) -> (i32, i32, i32) {
    %c0_i32 = arith.constant 0 : i32
    %c0_i32_0 = arith.constant 0 : i32
    %c0_i32_1 = arith.constant 0 : i32
    return %arg0, %c0_i32, %c0_i32_0 : i32, i32, i32
  }
  func.func @transform_2(%arg0: i32, %arg1: i32) -> (i32, i32) {
    %c0_i32 = arith.constant 0 : i32
    %c0_i32_0 = arith.constant 0 : i32
    %c0_i32_1 = arith.constant 0 : i32
    return %c0_i32, %c0_i32_0 : i32, i32
  }
  func.func @transform_3(%arg0: i32, %arg1: i32) -> (i32, i32) {
    %c0_i32 = arith.constant 0 : i32
    %c0_i32_0 = arith.constant 0 : i32
    %c0_i32_1 = arith.constant 0 : i32
    return %c0_i32, %c0_i32_0 : i32, i32
  }
  func.func @transform_4(%arg0: i32, %arg1: i32) -> (i32, i32) {
    %c0_i32 = arith.constant 0 : i32
    %c0_i32_0 = arith.constant 0 : i32
    %c0_i32_1 = arith.constant 0 : i32
    return %c0_i32, %c0_i32_0 : i32, i32
  }
  func.func @transform_5(%arg0: i32, %arg1: i32) -> (i32, i32, i32) {
    %c0_i32 = arith.constant 0 : i32
    %c0_i32_0 = arith.constant 0 : i32
    return %arg0, %arg1, %c0_i32 : i32, i32, i32
  }
}

</mosaic_0001>

<bundles_post_ra>
// kernel: tpu_custom_call.1
= control target key start
LH: loop header
LB: loop body
LE: loop exit
PB: predicated region body
PF: predicated region fallthrough
CT: control target
= control target key end

     0   :  { %s1256_s0 = inlined_call_operand.hbm [shape: f32[2,8,16], index: 0, kind: input, shape index: {}]   ;;  %s1257_s1 = inlined_call_operand.hbm [shape: f32[2,1,32], index: 1, kind: input, shape index: {}]   ;;  %s1258_s2 = inlined_call_operand.hbm [shape: f32[16,96], index: 2, kind: input, shape index: {}]   ;;  %s1259_s3 = inlined_call_operand.vmem [shape: f32[1,96], index: 3, kind: input, shape index: {}]   ;;  %s1260_s4 = inlined_call_operand.hbm [shape: f32[8,8], index: 4, kind: input, shape index: {}]   ;;  %s1261_s5 = inlined_call_operand.hbm [shape: f32[2,8,32], index: 5, kind: output, shape index: {}]  }
   0x1   :  { %1265 = sst [smem:[#allocation23_spill]] %s1258_s2 }
   0x2   :  { %1266 = sst [smem:[#allocation24_spill]] %s1260_s4 }
   0x3   :  { %10 = vsyncpa [#allocation6], 0 }
   0x4   :  { %12 = vsyncpa [#allocation6 + $0x1], 0 }
   0x5   :  { %13 = vsyncpa [#allocation9], 0 }
   0x6   :  { %15 = vsyncpa [#allocation9 + $0x1], 0 }
   0x7   :  { %16 = vsyncpa [#allocation12], 0 }
   0x8   :  { %17 = vsyncpa [#allocation7], 0 }
   0x9   :  { %19 = vsyncpa [#allocation7 + $0x1], 0  ;;  %s1064_s18 = smov 0   ;;  %s1066_s19 = smov 0  }
   0xa   :  { %s1068_s20 = smov 0   ;;  %s1070_s21 = smov 0  }
   0xb   :  { %s1072_s22 = smov 0   ;;  %s1074_s23 = smov 0  }
   0xc LB: > { %1267 = sst [smem:[#allocation19_spill]] %s1012_s20  ;;  %s1095_s24 = sadd.s32 4294967295, %s1024_s23   ;;  %s1024_s23 = sphi %s1074_s23, %s25_s23   ;;  %s1020_s22 = sphi %s1072_s22, %s1285_s22   ;;  %s1016_s21 = sphi %s1070_s21, %s1284_s21   ;;  %s1012_s20 = sphi %s1068_s20, %s1280_s20   ;;  %s1008_s19 = sphi %s1066_s19, %s1283_s19   ;;  %s1004_s18 = sphi %s1064_s18, %s1282_s18  }
   0xd   : > { %p672_p0 = scmp.ge.s32.totalorder %s1024_s23, 1  ;;  %p60_p1 = scmp.eq.s32.totalorder %s1095_s24, 0 }
   0xe   : > { %p187_p2 = scmp.lt.s32.totalorder %s1024_s23, 3  ;;  %s1268_s2 = sld [smem:[#allocation23_spill]] }
   0xf   : > { %s1026_s29 = smov [#allocation10]   ;;  %p675_p6 = scmp.ge.s32.totalorder %s1024_s23, 2 }
  0x10   : > { %p1103_p3 = pnand %p672_p0, %p187_p2  ;;  %s200_s30 = sshll.u32 %s1026_s29, 4  ;;  %s201_s30 = int_to_ptr.vmem [resolvable:$true] %s200_s30 }
  0x11   : > { %s1270_s4 = sld [smem:[#allocation24_spill]]  ;;  %s1027_s9 = smov 128  }
  0x12   : > { %p704_p4 = pneg %p1103_p3  ;;  %s1028_s10 = smov 8  }
  0x13   : > { %s1029_s11 = smov [#allocation11]   ;;  %s671_s13 = sadd.s32 4294967294, %s1024_s23  }
  0x14   : > { %s198_s27 = sshll.u32 %s1268_s2, 4  ;;  %p705_p5 = pnand %p704_p4, %p60_p1  ;;  %s199_s27 = int_to_ptr.hbm [resolvable:$true] %s198_s27 }
  0x15   : > { %s218_s12 = sshll.u32 %s1029_s11, 4  ;;  %s37_s14 = sadd.s32 1, %s1020_s22  ;;  %s219_s12 = int_to_ptr.vmem [resolvable:$true] %s218_s12 }
  0x16   : > { %707 = dma.hbm_to_vmem [thread:$0]  (!%p705_p5), %s199_s27, 256, %s201_s30, [#allocation9], %s1027_s9, %s1027_s9, %s1028_s10  }
  0x17   : > { %s216_s8 = sshll.u32 %s1270_s4, 4  ;;  %p39_p7 = scmp.ge.s32.totalorder %s37_s14, 2  ;;  %s217_s8 = int_to_ptr.hbm [resolvable:$true] %s216_s8 }
  0x18   : > { %710 = dma.hbm_to_vmem [thread:$0]  (!%p705_p5), %s217_s8, 128, %s219_s12, [#allocation12]  }
  0x19   : > { %s46_s15 = sadd.s32 1, %s1012_s20  ;;  %p53_p8 = scmp.ne.s32.totalorder %s1012_s20, %s1008_s19 }
  0x1a   : > { %p54_p9 = scmp.eq.s32.totalorder %s1024_s23, 0  ;;  %s1287_s14 = smov (%p39_p7, %s37_s14), 0 }
  0x1b   : > { %1271 = sst [smem:[#allocation20_spill]] %s1287_s14  ;;  %p59_p11 = scmp.ne.s32.totalorder %s1008_s19, %s1004_s18 }
  0x1c   : > { %p1123_p10 = por %p54_p9, %p53_p8  ;;  %s41_s17 = ssub.s32 %s1020_s22, %s1287_s14 }
  0x1d   : > { %p174_p12 = scmp.eq.s32.totalorder %s1095_s24, 1  ;;  %p44_p13 = scmp.eq.s32.totalorder %s41_s17, 0 }
  0x1e   : > { %p1134_p0 = por %p60_p1, %p59_p11  ;;  %p180_p4 = scmp.eq.s32.totalorder %s671_s13, 1 }
  0x1f   : > { %p1138_p2 = por %p174_p12, %p53_p8  ;;  %p724_p7 = scmp.lt.s32.totalorder %s1024_s23, 2 }
  0x20   : > { %s1143_s27 = scalar_select %p44_p13, %s1012_s20, %s46_s15  }
  0x21   : > { %p1145_p5 = por %p180_p4, %p59_p11  ;;  %s229_s30 = sand.u32 1, %s1012_s20  }
  0x22   : > { %1275 = sst [smem:[#allocation21_spill]] %s1143_s27  ;;  %s677_s6 = sshll.u32 %s1020_s22, 3 }
  0x23   : > { %s1276_s29 = scalar_select %p1145_p5, 1, 0 }
  0x24   : > { %s676_s7 = sshll.u32 %s229_s30, 3  ;;  %s238_s10 = scalar_lea.hbm %s1256_s0, %s677_s6 }
  0x25   : > { %1277 = sst [smem:[#allocation22_spill]] %s1276_s29  ;;  %s240_s11 = sshll.u32 %s238_s10, 4  ;;  %s241_s11 = int_to_ptr.hbm [resolvable:$true] %s240_s11 }
  0x26   : > { %s233_s12 = scalar_lea.vmem [#allocation5], %s676_s7  ;;  %p712_p8 = pnand %p724_p7, %p1123_p10 }
  0x27   : > { %s242_s17 = sshll.u32 %s233_s12, 4  ;;  %s249_s13 = sand.u32 1, %s1024_s23   ;;  %s243_s17 = int_to_ptr.vmem [resolvable:$true] %s242_s17 }
  0x28   : > { %s255_s4 = scalar_lea.hbm %s1257_s1, %s1020_s22  ;;  %s230_s14 = scalar_lea.sflag [#allocation6], %s229_s30 }
  0x29   : > { %714 = dma.hbm_to_vmem [thread:$0]  (!%p712_p8), %s241_s11, 128, %s243_s17, %s230_s14  }
  0x2a   : > { %s257_s27 = sshll.u32 %s255_s4, 4  ;;  %s252_s20 = scalar_lea.vmem [#allocation8], %s229_s30  ;;  %s258_s27 = int_to_ptr.hbm [resolvable:$true] %s257_s27 }
  0x2b   : > { %s259_s29 = sshll.u32 %s252_s20, 4  ;;  %s250_s6 = scalar_lea.sflag [#allocation9], %s249_s13  ;;  %s260_s29 = int_to_ptr.vmem [resolvable:$true] %s259_s29 }
  0x2c   : > { %717 = dma.hbm_to_vmem [thread:$0]  (!%p712_p8), %s258_s27, 16, %s260_s29, %s250_s6  }
  0x2d   : > { %268 = sbr.rel (%p1103_p3) target bundleno = 684 (0x2ac), region = 40  ;;  %s1165_s16 = sand.u32 (!%p1103_p3), 1, %s1008_s19  }
  0x2e   : > { %s679_s2 = sshll.u32 (!%p1103_p3), %s1165_s16, 3  ;;  %s271_s7 = scalar_lea.sflag (!%p1103_p3), [#allocation6], %s1165_s16 }
  0x2f   : > { %s274_s4 = scalar_lea.vmem (!%p1103_p3), [#allocation5], %s679_s2 }
  0x32   : > { %983 = dma.done.wait (%p1134_p0), %s271_s7, 128  }
  0x33   : > { %985 = vsyncadd (%p1134_p0), %s271_s7, 4294967168  ;;  %s280_s20 = sand.u32 1, %s1095_s24   ;;  %s283_s14 = scalar_lea.vmem [#allocation8], %s1165_s16 }
  0x34   : > { %s281_s28 = scalar_lea.sflag [#allocation9], %s280_s20 }
  0x35   : > { %987 = dma.done.wait (%p1134_p0), %s281_s28, 16  }
  0x36   : > { %989 = vsyncadd (%p1134_p0), %s281_s28, 4294967280 }
  0x37   : > { %991 = dma.done.wait (%p60_p1), [#allocation9], 256  }
  0x38   : > { %993 = vsyncadd (%p60_p1), [#allocation9], 4294967040 }
  0x39   : > { %995 = dma.done.wait (%p60_p1), [#allocation12], 128  }
  0x3a   : > { %997 = vsyncadd (%p60_p1), [#allocation12], 4294967168  ;;  %v362_v0 = vld [vmem:[#allocation10 + $0x8] sm:$0xff]  ;;  %v361_v1 = vld [vmem:[#allocation10] sm:$0xff]  ;;  %vm367_vm0 = vcmask 130048   ;;  %s1030_s24 = smov 96  }
  0x3b   : > { %385 = vmatpush.msra.mxu0 %v362_v0  ;;  %v360_v2 = vld [vmem:[%s274_s4] sm:$0xff]  ;;  %v784_v3 = vld [vmem:[%s1259_s3] ss:$0 sm:$0xff]  ;;  %s1031_s29 = smov 64   ;;  %vm329_vm4 = vcmask 253952   ;;  %v1032_v31 = vmov 0.0  }
  0x3c   : > { %330 = vst.msk [vmem:[#allocation2] sm:$0x1] %vm329_vm4, %v1032_v31  ;;  %v1201_v48 = vld [vmem:[#allocation11] sm:$0xff]  ;;  %vm448_vm7 = vcmask 64512   ;;  %v331_v49 = vld [vmem:[%s283_s14] sm:$0x1] }
  0x3d   : > { %386 = vmatpush.msra.mxu0 %v361_v1  ;;  %v337_v50 = vsub.f32 0.0, %v331_v49  ;;  %v333_v56 = vmax.f32 %v331_v49, 0.0  ;;  %vm332_vm10 = vcmp.ge.f32.partialorder %v331_v49, 0.0  ;;  %vm530_vm11 = vcmask 261127   ;;  %s687_s30 = sshll.u32 %s1016_s21, 3  ;;  %s324_s11 = scalar_lea.vmem [#allocation13], %s679_s2 }
  0x3e   : > { %683 = vmatmul.msk.f32.vlgmr.msra.gmra.mxu0 %vm367_vm0, %v360_v2  ;;  %vm479_vm12 = vcmask 261120   ;;  %s547_s10 = scalar_lea.hbm %s1261_s5, %s687_s30  ;;  %s549_s12 = sshll.u32 %s324_s11, 4  ;;  %s550_s12 = int_to_ptr.vmem [resolvable:$true] %s549_s12 }
  0x3f   : > { %v341_v51 = vand.u32 2147483647, %v337_v50  ;;  %v334_v58 = vadd.f32 0.5, %v333_v56  ;;  %v338_v0 = vmax.f32 %v337_v50, 0.0  ;;  %vm339_vm9 = vcmp.ne.f32.partialorder %v337_v50, %v337_v50  ;;  %s551_s17 = sshll.u32 %s547_s10, 4  ;;  %s536_s13 = scalar_lea.sflag [#allocation7], %s1165_s16  ;;  %s552_s17 = int_to_ptr.hbm [resolvable:$true] %s551_s17 }
  0x40   : > { %s944_s15 = sshra.s32 %s552_s17, 4  ;;  %s950_s4 = scalar_lea.hbm %s1261_s5, 16  ;;  %s945_s15 = int_to_ptr.hbm [resolvable:$true] %s944_s15 }
  0x41   : > { %v342_v52 = vsub.f32 0.0, %v341_v51  ;;  %s946_s21 = scalar_lea.hbm %s945_s15, 8  ;;  %p951_p10 = scmp.lt.s32.totalorder %s945_s15, %s1261_s5 }
  0x42   : > { %p947_p1 = scmp.ne.s32.totalorder %s945_s15, %s946_s21  ;;  %p952_p11 = scmp.lt.s32.totalorder %s950_s4, %s946_s21 }
  0x43   : > { %v343_v53 = vmul.f32 1.442695, %v342_v52 }
  0x44   : > { %p948_p3 = pnand %p947_p1, %p1138_p2  ;;  %p953_p12 = por %p952_p11, %p951_p10 }
  0x46   : > { %p949_p9 = pneg %p948_p3 }
  0x48   : > { %p954_p13 = pnand %p953_p12, %p949_p9 }
  0xbb   : > { %v388_v4 = vpop.f32.mrf.mxu0 }
  0xbc   : > { %v389_v5 = vadd.f32 %v784_v3, %v388_v4 }
  0xbe   : > { %v391_v6 = vsub.f32 0.0, %v389_v5  ;;  %v436_v13 = vmax.f32 %v389_v5, 0.0  ;;  %vm435_vm3 = vcmp.ge.f32.partialorder %v389_v5, 0.0 }
  0xc0   : > { %v395_v7 = vand.u32 2147483647, %v391_v6  ;;  %v437_v16 = vadd.f32 0.5, %v436_v13  ;;  %v392_v20 = vmax.f32 %v391_v6, 0.0  ;;  %vm393_vm2 = vcmp.ne.f32.partialorder %v391_v6, %v391_v6 }
  0xc2   : > { %v396_v8 = vsub.f32 0.0, %v395_v7 }
  0xc4   : > { %v397_v9 = vmul.f32 1.442695, %v396_v8  ;;  %v1033_v8 = vmov 1.0  }
  0xc5   : > { %359 = vst.msk [vmem:[#allocation4] sm:$0x1] %vm329_vm4, %v1033_v8 }
  0xc6   : > { %786 = vpow2.f32 %v397_v9  ;;  %v785_v9 = vld [vmem:[#allocation2] ss:$0 sm:$0xff] }
  0xcc   : > { %v787_v10 = vpop.eup %786 }
  0xcd   : > { %v399_v11 = vadd.f32 1.0, %v787_v10  ;;  %v402_v12 = vmul.f32 -0.5, %v787_v10  ;;  %v405_v15 = vand.u32 2147483647, %v787_v10 }
  0xcf   : > { %788 = vlog2.f32 %v399_v11  ;;  %v403_v14 = vadd.f32 1.0, %v402_v12  ;;  %vm406_vm1 = vcmp.lt.f32.partialorder %v405_v15, 0.0004427343 }
  0xd0   : > { %790 = vlog2.f32 %v437_v16 }
  0xd1   : > { %v404_v19 = vmul.f32 %v787_v10, %v403_v14 }
  0xd5   : > { %v789_v17 = vpop.eup %788 }
  0xd6   : > { %v401_v18 = vmul.f32 0.6931472, %v789_v17  ;;  %v791_v24 = vpop.eup %790 }
  0xd7   : > { %v439_v26 = vmul.f32 0.6931472, %v791_v24 }
  0xd8   : > { %v407_v21 = vsel %vm406_vm1, %v404_v19, %v401_v18 }
  0xd9   : > { %v408_v22 = vadd.f32 %v407_v21, %v392_v20 }
  0xdb   : > { %v409_v23 = vsel %vm393_vm2, %v391_v6, %v408_v22 }
  0xdc   : > { %411 = vrot.lane.b32.xlu0 %v409_v23, %s1030_s24  ;;  %v440_v25 = vsub.f32 0.0, %v409_v23 }
  0xde   : > { %v441_v27 = vsel %vm435_vm3, %v439_v26, %v440_v25 }
  0xe4   : > { %443 = vrot.lane.b32.xlu0 %v441_v27, %s1031_s29 }
 0x14e   : > { %v412_v28 = vpop.permute.xlu0 %411 }
 0x14f   : > { %v1192_v29 = vsub.f32 %v409_v23, %v412_v28 }
 0x151   : > { %v418_v30 = vand.u32 2147483647, %v1192_v29  ;;  %v415_v42 = vmax.f32 %v1192_v29, 0.0  ;;  %vm416_vm6 = vcmp.ne.f32.partialorder %v1192_v29, %v1192_v29 }
 0x153   : > { %v419_v32 = vsub.f32 0.0, %v418_v30 }
 0x155   : > { %v420_v33 = vmul.f32 1.442695, %v419_v32  ;;  %v488_v32 = vld [vmem:[#allocation4] sm:$0x1] }
 0x156   : > { %v444_v10 = vpop.permute.xlu0 %443 }
 0x157   : > { %792 = vpow2.f32 %v420_v33 }
 0x15d   : > { %v793_v34 = vpop.eup %792 }
 0x15e   : > { %v422_v35 = vadd.f32 1.0, %v793_v34  ;;  %v425_v36 = vmul.f32 -0.5, %v793_v34  ;;  %v428_v38 = vand.u32 2147483647, %v793_v34 }
 0x160   : > { %794 = vlog2.f32 %v422_v35  ;;  %v426_v37 = vadd.f32 1.0, %v425_v36  ;;  %vm429_vm5 = vcmp.lt.f32.partialorder %v428_v38, 0.0004427343 }
 0x161   : > { %796 = vpow2.f32 %v343_v53 }
 0x162   : > { %v427_v41 = vmul.f32 %v793_v34, %v426_v37 }
 0x166   : > { %v795_v39 = vpop.eup %794 }
 0x167   : > { %v424_v40 = vmul.f32 0.6931472, %v795_v39  ;;  %v797_v54 = vpop.eup %796 }
 0x168   : > { %v345_v55 = vadd.f32 1.0, %v797_v54  ;;  %v348_v57 = vmul.f32 -0.5, %v797_v54  ;;  %v351_v61 = vand.u32 2147483647, %v797_v54 }
 0x169   : > { %v430_v43 = vsel %vm429_vm5, %v427_v41, %v424_v40 }
 0x16a   : > { %v431_v44 = vadd.f32 %v430_v43, %v415_v42  ;;  %798 = vlog2.f32 %v345_v55  ;;  %v349_v59 = vadd.f32 1.0, %v348_v57  ;;  %vm352_vm8 = vcmp.lt.f32.partialorder %v351_v61, 0.0004427343 }
 0x16b   : > { %800 = vlog2.f32 %v334_v58 }
 0x16c   : > { %v432_v45 = vsel %vm416_vm6, %v1192_v29, %v431_v44  ;;  %v350_v63 = vmul.f32 %v797_v54, %v349_v59 }
 0x16d   : > { %v434_v46 = vsub.f32 %v1192_v29, %v432_v45  ;;  %v433_v47 = vsub.f32 0.0, %v432_v45 }
 0x16f   : > { %467 = vmatpush.msra.mxu1 %v433_v47  ;;  %v446_v12 = vadd.f32 %v444_v10, %v434_v46 }
 0x170   : > { %684 = vmatmul.msk.f32.vlgmr.msra.gmra.mxu1 %vm448_vm7, %v1201_v48  ;;  %v799_v60 = vpop.eup %798 }
 0x171   : > { %v347_v62 = vmul.f32 0.6931472, %v799_v60  ;;  %v801_v3 = vpop.eup %800 }
 0x172   : > { %v336_v5 = vmul.f32 0.6931472, %v801_v3 }
 0x173   : > { %v353_v1 = vsel %vm352_vm8, %v350_v63, %v347_v62 }
 0x174   : > { %v354_v2 = vadd.f32 %v353_v1, %v338_v0 }
 0x176   : > { %v355_v4 = vsel %vm339_vm9, %v337_v50, %v354_v2 }
 0x177   : > { %v356_v6 = vsub.f32 0.0, %v355_v4 }
 0x179   : > { %v357_v7 = vsel %vm332_vm10, %v336_v5, %v356_v6 }
 0x17a   : > { %358 = vst.msk [vmem:[#allocation3] sm:$0x1] %vm329_vm4, %v357_v7 }
 0x181   : > { %v478_v21 = vld [vmem:[#allocation3] sm:$0x1] }
 0x1ed   : > { %v469_v11 = vpop.f32.mrf.mxu1 }
 0x1ee   : > { %v476_v13 = vadd.f32 %v785_v9, %v469_v11 }
 0x1f0   : > { %531 = vst.msk [vmem:[#allocation2 - $0x7] sm:$0x80] %vm530_vm11, %v476_v13  ;;  %v477_v14 = vsub.f32 %v446_v12, %v476_v13 }
 0x1f2   : > { %v480_v15 = vsel %vm479_vm12, %v477_v14, -inf }
 0x1f3   : > { %v481_v16 = vrot.slane %v480_v15, 4 }
 0x1f5   : > { %v482_v17 = vmax.f32 %v480_v15, %v481_v16 }
 0x1f7   : > { %v483_v18 = vrot.slane %v482_v17, 2 }
 0x1f9   : > { %v484_v19 = vmax.f32 %v482_v17, %v483_v18 }
 0x1fb   : > { %v485_v20 = vrot.slane %v484_v19, 1 }
 0x1fd   : > { %v486_v22 = vmax.f32 %v484_v19, %v485_v20 }
 0x1ff   : > { %v487_v23 = vmax.f32 %v478_v21, %v486_v22 }
 0x201   : > { %v494_v24 = vperm.slane %v487_v23, 0  ;;  %533 = vst.msk [vmem:[#allocation3] sm:$0x1] %vm329_vm4, %v487_v23  ;;  %v489_v25 = vsub.f32 %v478_v21, %v487_v23 }
 0x203   : > { %v496_v26 = vsub.f32 %v477_v14, %v494_v24  ;;  %v523_v27 = vadd.f32 %v494_v24, %v476_v13  ;;  %v490_v30 = vmul.f32 1.442695, %v489_v25 }
 0x205   : > { %v497_v28 = vmul.f32 1.442695, %v496_v26 }
 0x207   : > { %802 = vpow2.f32 %v497_v28 }
 0x208   : > { %804 = vpow2.f32 %v490_v30 }
 0x20d   : > { %v803_v29 = vpop.eup %802 }
 0x20e   : > { %514 = vmatpush.msra.mxu2 %v803_v29  ;;  %v805_v31 = vpop.eup %804 }
 0x20f   : > { %685 = vmatmul.msk.f32.vlgmr.msra.gmra.mxu2 %vm448_vm7, %v1201_v48  ;;  %v492_v33 = vmul.f32 %v805_v31, %v488_v32 }
 0x211   : > { %v520_v34 = vperm.slane %v492_v33, 0 }
 0x292   : > { %v516_v35 = vpop.f32.mrf.mxu2 }
 0x293   : > { %v522_v36 = vadd.f32 %v520_v34, %v516_v35 }
 0x295   : > { %806 = vlog2.f32 %v522_v36  ;;  %534 = vst.msk [vmem:[#allocation4 - $0x7] sm:$0x80] %vm530_vm11, %v522_v36 }
 0x29b   : > { %v807_v37 = vpop.eup %806 }
 0x29c   : > { %v525_v38 = vmul.f32 0.6931472, %v807_v37 }
 0x29e   : > { %v526_v39 = vadd.f32 %v525_v38, %v523_v27 }
 0x2a0   : > { %v527_v40 = vmul.f32 1.442695, %v526_v39 }
 0x2a2   : > { %808 = vpow2.f32 %v527_v40 }
 0x2a8   : > { %v809_v41 = vpop.eup %808 }
 0x2a9   : > { %529 = vst.msk [vmem:[%s324_s11] sm:$0xff] %vm479_vm12, %v809_v41 }
 0x2aa   : > { %957 = shalt.err (!%p954_p13)
}
 0x2ab   : > { %702 = dma.vmem_to_hbm [thread:$0]  (%p1138_p2), %s550_s12, 128, %s552_s17, %s536_s13  }
 0x2ac PF: > { %s563_s28 = sand.u32 1, %s1004_s18   ;;  %p719_p0 = pnand %p675_p6, %p1145_p5 }
 0x2ad   : > { %s564_s14 = scalar_lea.sflag [#allocation7], %s563_s28 }
 0x2ae   : > { %p720_p4 = pneg %p719_p0 }
 0x2b0   : > { %999 = dma.done.wait (%p720_p4), %s564_s14, 128  }
 0x2b1   : > { %1001 = vsyncadd (%p720_p4), %s564_s14, 4294967168  ;;  %s25_s23 = sadd.s32 1, %s1024_s23   ;;  %s1279_s25 = sld [smem:[#allocation19_spill]] }
 0x2b2   : > { %p22_p7 = scmp.ge.s32.totalorder %s25_s23, 4   ;;  %s1280_s20 = sld [smem:[#allocation21_spill]] }
 0x2b3   : > { %s1281_s26 = sld [smem:[#allocation20_spill]]  ;;  %s1282_s18 = smov %s1008_s19 }
 0x2b4   : > { %s1284_s21 = smov %s1020_s22 }
 0x2b5   :  { %24 = sbr.rel (!%p22_p7) target bundleno = 12 (0xc), region = 110 }
 0x2b7   : > { %s1283_s19 = smov %s1279_s25 }
 0x2b9   : > { %s1285_s22 = smov %s1281_s26 }
 0x2ba   :  { %570 = vsyncpa [#allocation6], 1 }
 0x2bb   :  { %572 = vsyncpa [#allocation6 + $0x1], 1 }
 0x2bc   :  { %573 = vsyncpa [#allocation9], 1 }
 0x2bd   :  { %575 = vsyncpa [#allocation9 + $0x1], 1 }
 0x2be   :  { %576 = vsyncpa [#allocation12], 1 }
 0x2bf   :  { %577 = vsyncpa [#allocation7], 1 }
 0x2c0   :  { %579 = vsyncpa [#allocation7 + $0x1], 1 }

// kernel: tpu_custom_call.1
= control target key start
LH: loop header
LB: loop body
LE: loop exit
PB: predicated region body
PF: predicated region fallthrough
CT: control target
= control target key end

     0   :  { %s1256_s0 = inlined_call_operand.hbm [shape: f32[2,8,16], index: 0, kind: input, shape index: {}]   ;;  %s1257_s1 = inlined_call_operand.hbm [shape: f32[2,1,32], index: 1, kind: input, shape index: {}]   ;;  %s1258_s2 = inlined_call_operand.hbm [shape: f32[16,96], index: 2, kind: input, shape index: {}]   ;;  %s1259_s3 = inlined_call_operand.vmem [shape: f32[1,96], index: 3, kind: input, shape index: {}]   ;;  %s1260_s4 = inlined_call_operand.hbm [shape: f32[8,8], index: 4, kind: input, shape index: {}]   ;;  %s1261_s5 = inlined_call_operand.hbm [shape: f32[2,8,32], index: 5, kind: output, shape index: {}]  }
   0x1   :  { %1265 = sst [smem:[#allocation23_spill]] %s1258_s2 }
   0x2   :  { %1266 = sst [smem:[#allocation24_spill]] %s1260_s4 }
   0x3   :  { %10 = vsyncpa [#allocation6], 0 }
   0x4   :  { %12 = vsyncpa [#allocation6 + $0x1], 0 }
   0x5   :  { %13 = vsyncpa [#allocation9], 0 }
   0x6   :  { %15 = vsyncpa [#allocation9 + $0x1], 0 }
   0x7   :  { %16 = vsyncpa [#allocation12], 0 }
   0x8   :  { %17 = vsyncpa [#allocation7], 0 }
   0x9   :  { %19 = vsyncpa [#allocation7 + $0x1], 0  ;;  %s1064_s18 = smov 0   ;;  %s1066_s19 = smov 0  }
   0xa   :  { %s1068_s20 = smov 0   ;;  %s1070_s21 = smov 0  }
   0xb   :  { %s1072_s22 = smov 0   ;;  %s1074_s23 = smov 0  }
   0xc LB: > { %1267 = sst [smem:[#allocation19_spill]] %s1012_s20  ;;  %s1095_s24 = sadd.s32 4294967295, %s1024_s23   ;;  %s1024_s23 = sphi %s1074_s23, %s25_s23   ;;  %s1020_s22 = sphi %s1072_s22, %s1285_s22   ;;  %s1016_s21 = sphi %s1070_s21, %s1284_s21   ;;  %s1012_s20 = sphi %s1068_s20, %s1280_s20   ;;  %s1008_s19 = sphi %s1066_s19, %s1283_s19   ;;  %s1004_s18 = sphi %s1064_s18, %s1282_s18  }
   0xd   : > { %p672_p0 = scmp.ge.s32.totalorder %s1024_s23, 1  ;;  %p60_p1 = scmp.eq.s32.totalorder %s1095_s24, 0 }
   0xe   : > { %p187_p2 = scmp.lt.s32.totalorder %s1024_s23, 3  ;;  %s1268_s2 = sld [smem:[#allocation23_spill]] }
   0xf   : > { %s1026_s29 = smov [#allocation10]   ;;  %p675_p6 = scmp.ge.s32.totalorder %s1024_s23, 2 }
  0x10   : > { %p1103_p3 = pnand %p672_p0, %p187_p2  ;;  %s200_s30 = sshll.u32 %s1026_s29, 4  ;;  %s201_s30 = int_to_ptr.vmem [resolvable:$true] %s200_s30 }
  0x11   : > { %s1270_s4 = sld [smem:[#allocation24_spill]]  ;;  %s1027_s9 = smov 128  }
  0x12   : > { %p704_p4 = pneg %p1103_p3  ;;  %s1028_s10 = smov 8  }
  0x13   : > { %s1029_s11 = smov [#allocation11]   ;;  %s671_s13 = sadd.s32 4294967294, %s1024_s23  }
  0x14   : > { %s198_s27 = sshll.u32 %s1268_s2, 4  ;;  %p705_p5 = pnand %p704_p4, %p60_p1  ;;  %s199_s27 = int_to_ptr.hbm [resolvable:$true] %s198_s27 }
  0x15   : > { %s218_s12 = sshll.u32 %s1029_s11, 4  ;;  %s37_s14 = sadd.s32 1, %s1020_s22  ;;  %s219_s12 = int_to_ptr.vmem [resolvable:$true] %s218_s12 }
  0x16   : > { %707 = dma.hbm_to_vmem [thread:$0]  (!%p705_p5), %s199_s27, 256, %s201_s30, [#allocation9], %s1027_s9, %s1027_s9, %s1028_s10  }
  0x17   : > { %s216_s8 = sshll.u32 %s1270_s4, 4  ;;  %p39_p7 = scmp.ge.s32.totalorder %s37_s14, 2  ;;  %s217_s8 = int_to_ptr.hbm [resolvable:$true] %s216_s8 }
  0x18   : > { %710 = dma.hbm_to_vmem [thread:$0]  (!%p705_p5), %s217_s8, 128, %s219_s12, [#allocation12]  }
  0x19   : > { %s46_s15 = sadd.s32 1, %s1012_s20  ;;  %p53_p8 = scmp.ne.s32.totalorder %s1012_s20, %s1008_s19 }
  0x1a   : > { %p54_p9 = scmp.eq.s32.totalorder %s1024_s23, 0  ;;  %s1287_s14 = smov (%p39_p7, %s37_s14), 0 }
  0x1b   : > { %1271 = sst [smem:[#allocation20_spill]] %s1287_s14  ;;  %p59_p11 = scmp.ne.s32.totalorder %s1008_s19, %s1004_s18 }
  0x1c   : > { %p1123_p10 = por %p54_p9, %p53_p8  ;;  %s41_s17 = ssub.s32 %s1020_s22, %s1287_s14 }
  0x1d   : > { %p174_p12 = scmp.eq.s32.totalorder %s1095_s24, 1  ;;  %p44_p13 = scmp.eq.s32.totalorder %s41_s17, 0 }
  0x1e   : > { %p1134_p0 = por %p60_p1, %p59_p11  ;;  %p180_p4 = scmp.eq.s32.totalorder %s671_s13, 1 }
  0x1f   : > { %p1138_p2 = por %p174_p12, %p53_p8  ;;  %p724_p7 = scmp.lt.s32.totalorder %s1024_s23, 2 }
  0x20   : > { %s1143_s27 = scalar_select %p44_p13, %s1012_s20, %s46_s15  }
  0x21   : > { %p1145_p5 = por %p180_p4, %p59_p11  ;;  %s229_s30 = sand.u32 1, %s1012_s20  }
  0x22   : > { %1275 = sst [smem:[#allocation21_spill]] %s1143_s27  ;;  %s677_s6 = sshll.u32 %s1020_s22, 3 }
  0x23   : > { %s1276_s29 = scalar_select %p1145_p5, 1, 0 }
  0x24   : > { %s676_s7 = sshll.u32 %s229_s30, 3  ;;  %s238_s10 = scalar_lea.hbm %s1256_s0, %s677_s6 }
  0x25   : > { %1277 = sst [smem:[#allocation22_spill]] %s1276_s29  ;;  %s240_s11 = sshll.u32 %s238_s10, 4  ;;  %s241_s11 = int_to_ptr.hbm [resolvable:$true] %s240_s11 }
  0x26   : > { %s233_s12 = scalar_lea.vmem [#allocation5], %s676_s7  ;;  %p712_p8 = pnand %p724_p7, %p1123_p10 }
  0x27   : > { %s242_s17 = sshll.u32 %s233_s12, 4  ;;  %s249_s13 = sand.u32 1, %s1024_s23   ;;  %s243_s17 = int_to_ptr.vmem [resolvable:$true] %s242_s17 }
  0x28   : > { %s255_s4 = scalar_lea.hbm %s1257_s1, %s1020_s22  ;;  %s230_s14 = scalar_lea.sflag [#allocation6], %s229_s30 }
  0x29   : > { %714 = dma.hbm_to_vmem [thread:$0]  (!%p712_p8), %s241_s11, 128, %s243_s17, %s230_s14  }
  0x2a   : > { %s257_s27 = sshll.u32 %s255_s4, 4  ;;  %s252_s20 = scalar_lea.vmem [#allocation8], %s229_s30  ;;  %s258_s27 = int_to_ptr.hbm [resolvable:$true] %s257_s27 }
  0x2b   : > { %s259_s29 = sshll.u32 %s252_s20, 4  ;;  %s250_s6 = scalar_lea.sflag [#allocation9], %s249_s13  ;;  %s260_s29 = int_to_ptr.vmem [resolvable:$true] %s259_s29 }
  0x2c   : > { %717 = dma.hbm_to_vmem [thread:$0]  (!%p712_p8), %s258_s27, 16, %s260_s29, %s250_s6  }
  0x2d   : > { %268 = sbr.rel (%p1103_p3) target bundleno = 684 (0x2ac), region = 40  ;;  %s1165_s16 = sand.u32 (!%p1103_p3), 1, %s1008_s19  }
  0x2e   : > { %s679_s2 = sshll.u32 (!%p1103_p3), %s1165_s16, 3  ;;  %s271_s7 = scalar_lea.sflag (!%p1103_p3), [#allocation6], %s1165_s16 }
  0x2f   : > { %s274_s4 = scalar_lea.vmem (!%p1103_p3), [#allocation5], %s679_s2 }
  0x32   : > { %983 = dma.done.wait (%p1134_p0), %s271_s7, 128  }
  0x33   : > { %985 = vsyncadd (%p1134_p0), %s271_s7, 4294967168  ;;  %s280_s20 = sand.u32 1, %s1095_s24   ;;  %s283_s14 = scalar_lea.vmem [#allocation8], %s1165_s16 }
  0x34   : > { %s281_s28 = scalar_lea.sflag [#allocation9], %s280_s20 }
  0x35   : > { %987 = dma.done.wait (%p1134_p0), %s281_s28, 16  }
  0x36   : > { %989 = vsyncadd (%p1134_p0), %s281_s28, 4294967280 }
  0x37   : > { %991 = dma.done.wait (%p60_p1), [#allocation9], 256  }
  0x38   : > { %993 = vsyncadd (%p60_p1), [#allocation9], 4294967040 }
  0x39   : > { %995 = dma.done.wait (%p60_p1), [#allocation12], 128  }
  0x3a   : > { %997 = vsyncadd (%p60_p1), [#allocation12], 4294967168  ;;  %v362_v0 = vld [vmem:[#allocation10 + $0x8] sm:$0xff]  ;;  %v361_v1 = vld [vmem:[#allocation10] sm:$0xff]  ;;  %vm367_vm0 = vcmask 130048   ;;  %s1030_s24 = smov 96  }
  0x3b   : > { %385 = vmatpush.msra.mxu0 %v362_v0  ;;  %v360_v2 = vld [vmem:[%s274_s4] sm:$0xff]  ;;  %v784_v3 = vld [vmem:[%s1259_s3] ss:$0 sm:$0xff]  ;;  %s1031_s29 = smov 64   ;;  %vm329_vm4 = vcmask 253952   ;;  %v1032_v31 = vmov 0.0  }
  0x3c   : > { %330 = vst.msk [vmem:[#allocation2] sm:$0x1] %vm329_vm4, %v1032_v31  ;;  %v1201_v48 = vld [vmem:[#allocation11] sm:$0xff]  ;;  %vm448_vm7 = vcmask 64512   ;;  %v331_v49 = vld [vmem:[%s283_s14] sm:$0x1] }
  0x3d   : > { %386 = vmatpush.msra.mxu0 %v361_v1  ;;  %v337_v50 = vsub.f32 0.0, %v331_v49  ;;  %v333_v56 = vmax.f32 %v331_v49, 0.0  ;;  %vm332_vm10 = vcmp.ge.f32.partialorder %v331_v49, 0.0  ;;  %vm530_vm11 = vcmask 261127   ;;  %s687_s30 = sshll.u32 %s1016_s21, 3  ;;  %s324_s11 = scalar_lea.vmem [#allocation13], %s679_s2 }
  0x3e   : > { %683 = vmatmul.msk.f32.vlgmr.msra.gmra.mxu0 %vm367_vm0, %v360_v2  ;;  %vm479_vm12 = vcmask 261120   ;;  %s547_s10 = scalar_lea.hbm %s1261_s5, %s687_s30  ;;  %s549_s12 = sshll.u32 %s324_s11, 4  ;;  %s550_s12 = int_to_ptr.vmem [resolvable:$true] %s549_s12 }
  0x3f   : > { %v341_v51 = vand.u32 2147483647, %v337_v50  ;;  %v334_v58 = vadd.f32 0.5, %v333_v56  ;;  %v338_v0 = vmax.f32 %v337_v50, 0.0  ;;  %vm339_vm9 = vcmp.ne.f32.partialorder %v337_v50, %v337_v50  ;;  %s551_s17 = sshll.u32 %s547_s10, 4  ;;  %s536_s13 = scalar_lea.sflag [#allocation7], %s1165_s16  ;;  %s552_s17 = int_to_ptr.hbm [resolvable:$true] %s551_s17 }
  0x40   : > { %s944_s15 = sshra.s32 %s552_s17, 4  ;;  %s950_s4 = scalar_lea.hbm %s1261_s5, 16  ;;  %s945_s15 = int_to_ptr.hbm [resolvable:$true] %s944_s15 }
  0x41   : > { %v342_v52 = vsub.f32 0.0, %v341_v51  ;;  %s946_s21 = scalar_lea.hbm %s945_s15, 8  ;;  %p951_p10 = scmp.lt.s32.totalorder %s945_s15, %s1261_s5 }
  0x42   : > { %p947_p1 = scmp.ne.s32.totalorder %s945_s15, %s946_s21  ;;  %p952_p11 = scmp.lt.s32.totalorder %s950_s4, %s946_s21 }
  0x43   : > { %v343_v53 = vmul.f32 1.442695, %v342_v52 }
  0x44   : > { %p948_p3 = pnand %p947_p1, %p1138_p2  ;;  %p953_p12 = por %p952_p11, %p951_p10 }
  0x46   : > { %p949_p9 = pneg %p948_p3 }
  0x48   : > { %p954_p13 = pnand %p953_p12, %p949_p9 }
  0xbb   : > { %v388_v4 = vpop.f32.mrf.mxu0 }
  0xbc   : > { %v389_v5 = vadd.f32 %v784_v3, %v388_v4 }
  0xbe   : > { %v391_v6 = vsub.f32 0.0, %v389_v5  ;;  %v436_v13 = vmax.f32 %v389_v5, 0.0  ;;  %vm435_vm3 = vcmp.ge.f32.partialorder %v389_v5, 0.0 }
  0xc0   : > { %v395_v7 = vand.u32 2147483647, %v391_v6  ;;  %v437_v16 = vadd.f32 0.5, %v436_v13  ;;  %v392_v20 = vmax.f32 %v391_v6, 0.0  ;;  %vm393_vm2 = vcmp.ne.f32.partialorder %v391_v6, %v391_v6 }
  0xc2   : > { %v396_v8 = vsub.f32 0.0, %v395_v7 }
  0xc4   : > { %v397_v9 = vmul.f32 1.442695, %v396_v8  ;;  %v1033_v8 = vmov 1.0  }
  0xc5   : > { %359 = vst.msk [vmem:[#allocation4] sm:$0x1] %vm329_vm4, %v1033_v8 }
  0xc6   : > { %786 = vpow2.f32 %v397_v9  ;;  %v785_v9 = vld [vmem:[#allocation2] ss:$0 sm:$0xff] }
  0xcc   : > { %v787_v10 = vpop.eup %786 }
  0xcd   : > { %v399_v11 = vadd.f32 1.0, %v787_v10  ;;  %v402_v12 = vmul.f32 -0.5, %v787_v10  ;;  %v405_v15 = vand.u32 2147483647, %v787_v10 }
  0xcf   : > { %788 = vlog2.f32 %v399_v11  ;;  %v403_v14 = vadd.f32 1.0, %v402_v12  ;;  %vm406_vm1 = vcmp.lt.f32.partialorder %v405_v15, 0.0004427343 }
  0xd0   : > { %790 = vlog2.f32 %v437_v16 }
  0xd1   : > { %v404_v19 = vmul.f32 %v787_v10, %v403_v14 }
  0xd5   : > { %v789_v17 = vpop.eup %788 }
  0xd6   : > { %v401_v18 = vmul.f32 0.6931472, %v789_v17  ;;  %v791_v24 = vpop.eup %790 }
  0xd7   : > { %v439_v26 = vmul.f32 0.6931472, %v791_v24 }
  0xd8   : > { %v407_v21 = vsel %vm406_vm1, %v404_v19, %v401_v18 }
  0xd9   : > { %v408_v22 = vadd.f32 %v407_v21, %v392_v20 }
  0xdb   : > { %v409_v23 = vsel %vm393_vm2, %v391_v6, %v408_v22 }
  0xdc   : > { %411 = vrot.lane.b32.xlu0 %v409_v23, %s1030_s24  ;;  %v440_v25 = vsub.f32 0.0, %v409_v23 }
  0xde   : > { %v441_v27 = vsel %vm435_vm3, %v439_v26, %v440_v25 }
  0xe4   : > { %443 = vrot.lane.b32.xlu0 %v441_v27, %s1031_s29 }
 0x14e   : > { %v412_v28 = vpop.permute.xlu0 %411 }
 0x14f   : > { %v1192_v29 = vsub.f32 %v409_v23, %v412_v28 }
 0x151   : > { %v418_v30 = vand.u32 2147483647, %v1192_v29  ;;  %v415_v42 = vmax.f32 %v1192_v29, 0.0  ;;  %vm416_vm6 = vcmp.ne.f32.partialorder %v1192_v29, %v1192_v29 }
 0x153   : > { %v419_v32 = vsub.f32 0.0, %v418_v30 }
 0x155   : > { %v420_v33 = vmul.f32 1.442695, %v419_v32  ;;  %v488_v32 = vld [vmem:[#allocation4] sm:$0x1] }
 0x156   : > { %v444_v10 = vpop.permute.xlu0 %443 }
 0x157   : > { %792 = vpow2.f32 %v420_v33 }
 0x15d   : > { %v793_v34 = vpop.eup %792 }
 0x15e   : > { %v422_v35 = vadd.f32 1.0, %v793_v34  ;;  %v425_v36 = vmul.f32 -0.5, %v793_v34  ;;  %v428_v38 = vand.u32 2147483647, %v793_v34 }
 0x160   : > { %794 = vlog2.f32 %v422_v35  ;;  %v426_v37 = vadd.f32 1.0, %v425_v36  ;;  %vm429_vm5 = vcmp.lt.f32.partialorder %v428_v38, 0.0004427343 }
 0x161   : > { %796 = vpow2.f32 %v343_v53 }
 0x162   : > { %v427_v41 = vmul.f32 %v793_v34, %v426_v37 }
 0x166   : > { %v795_v39 = vpop.eup %794 }
 0x167   : > { %v424_v40 = vmul.f32 0.6931472, %v795_v39  ;;  %v797_v54 = vpop.eup %796 }
 0x168   : > { %v345_v55 = vadd.f32 1.0, %v797_v54  ;;  %v348_v57 = vmul.f32 -0.5, %v797_v54  ;;  %v351_v61 = vand.u32 2147483647, %v797_v54 }
 0x169   : > { %v430_v43 = vsel %vm429_vm5, %v427_v41, %v424_v40 }
 0x16a   : > { %v431_v44 = vadd.f32 %v430_v43, %v415_v42  ;;  %798 = vlog2.f32 %v345_v55  ;;  %v349_v59 = vadd.f32 1.0, %v348_v57  ;;  %vm352_vm8 = vcmp.lt.f32.partialorder %v351_v61, 0.0004427343 }
 0x16b   : > { %800 = vlog2.f32 %v334_v58 }
 0x16c   : > { %v432_v45 = vsel %vm416_vm6, %v1192_v29, %v431_v44  ;;  %v350_v63 = vmul.f32 %v797_v54, %v349_v59 }
 0x16d   : > { %v434_v46 = vsub.f32 %v1192_v29, %v432_v45  ;;  %v433_v47 = vsub.f32 0.0, %v432_v45 }
 0x16f   : > { %467 = vmatpush.msra.mxu1 %v433_v47  ;;  %v446_v12 = vadd.f32 %v444_v10, %v434_v46 }
 0x170   : > { %684 = vmatmul.msk.f32.vlgmr.msra.gmra.mxu1 %vm448_vm7, %v1201_v48  ;;  %v799_v60 = vpop.eup %798 }
 0x171   : > { %v347_v62 = vmul.f32 0.6931472, %v799_v60  ;;  %v801_v3 = vpop.eup %800 }
 0x172   : > { %v336_v5 = vmul.f32 0.6931472, %v801_v3 }
 0x173   : > { %v353_v1 = vsel %vm352_vm8, %v350_v63, %v347_v62 }
 0x174   : > { %v354_v2 = vadd.f32 %v353_v1, %v338_v0 }
 0x176   : > { %v355_v4 = vsel %vm339_vm9, %v337_v50, %v354_v2 }
 0x177   : > { %v356_v6 = vsub.f32 0.0, %v355_v4 }
 0x179   : > { %v357_v7 = vsel %vm332_vm10, %v336_v5, %v356_v6 }
 0x17a   : > { %358 = vst.msk [vmem:[#allocation3] sm:$0x1] %vm329_vm4, %v357_v7 }
 0x181   : > { %v478_v21 = vld [vmem:[#allocation3] sm:$0x1] }
 0x1ed   : > { %v469_v11 = vpop.f32.mrf.mxu1 }
 0x1ee   : > { %v476_v13 = vadd.f32 %v785_v9, %v469_v11 }
 0x1f0   : > { %531 = vst.msk [vmem:[#allocation2 - $0x7] sm:$0x80] %vm530_vm11, %v476_v13  ;;  %v477_v14 = vsub.f32 %v446_v12, %v476_v13 }
 0x1f2   : > { %v480_v15 = vsel %vm479_vm12, %v477_v14, -inf }
 0x1f3   : > { %v481_v16 = vrot.slane %v480_v15, 4 }
 0x1f5   : > { %v482_v17 = vmax.f32 %v480_v15, %v481_v16 }
 0x1f7   : > { %v483_v18 = vrot.slane %v482_v17, 2 }
 0x1f9   : > { %v484_v19 = vmax.f32 %v482_v17, %v483_v18 }
 0x1fb   : > { %v485_v20 = vrot.slane %v484_v19, 1 }
 0x1fd   : > { %v486_v22 = vmax.f32 %v484_v19, %v485_v20 }
 0x1ff   : > { %v487_v23 = vmax.f32 %v478_v21, %v486_v22 }
 0x201   : > { %v494_v24 = vperm.slane %v487_v23, 0  ;;  %533 = vst.msk [vmem:[#allocation3] sm:$0x1] %vm329_vm4, %v487_v23  ;;  %v489_v25 = vsub.f32 %v478_v21, %v487_v23 }
 0x203   : > { %v496_v26 = vsub.f32 %v477_v14, %v494_v24  ;;  %v523_v27 = vadd.f32 %v494_v24, %v476_v13  ;;  %v490_v30 = vmul.f32 1.442695, %v489_v25 }
 0x205   : > { %v497_v28 = vmul.f32 1.442695, %v496_v26 }
 0x207   : > { %802 = vpow2.f32 %v497_v28 }
 0x208   : > { %804 = vpow2.f32 %v490_v30 }
 0x20d   : > { %v803_v29 = vpop.eup %802 }
 0x20e   : > { %514 = vmatpush.msra.mxu2 %v803_v29  ;;  %v805_v31 = vpop.eup %804 }
 0x20f   : > { %685 = vmatmul.msk.f32.vlgmr.msra.gmra.mxu2 %vm448_vm7, %v1201_v48  ;;  %v492_v33 = vmul.f32 %v805_v31, %v488_v32 }
 0x211   : > { %v520_v34 = vperm.slane %v492_v33, 0 }
 0x292   : > { %v516_v35 = vpop.f32.mrf.mxu2 }
 0x293   : > { %v522_v36 = vadd.f32 %v520_v34, %v516_v35 }
 0x295   : > { %806 = vlog2.f32 %v522_v36  ;;  %534 = vst.msk [vmem:[#allocation4 - $0x7] sm:$0x80] %vm530_vm11, %v522_v36 }
 0x29b   : > { %v807_v37 = vpop.eup %806 }
 0x29c   : > { %v525_v38 = vmul.f32 0.6931472, %v807_v37 }
 0x29e   : > { %v526_v39 = vadd.f32 %v525_v38, %v523_v27 }
 0x2a0   : > { %v527_v40 = vmul.f32 1.442695, %v526_v39 }
 0x2a2   : > { %808 = vpow2.f32 %v527_v40 }
 0x2a8   : > { %v809_v41 = vpop.eup %808 }
 0x2a9   : > { %529 = vst.msk [vmem:[%s324_s11] sm:$0xff] %vm479_vm12, %v809_v41 }
 0x2aa   : > { %957 = shalt.err (!%p954_p13)
}
 0x2ab   : > { %702 = dma.vmem_to_hbm [thread:$0]  (%p1138_p2), %s550_s12, 128, %s552_s17, %s536_s13  }
 0x2ac PF: > { %s563_s28 = sand.u32 1, %s1004_s18   ;;  %p719_p0 = pnand %p675_p6, %p1145_p5 }
 0x2ad   : > { %s564_s14 = scalar_lea.sflag [#allocation7], %s563_s28 }
 0x2ae   : > { %p720_p4 = pneg %p719_p0 }
 0x2b0   : > { %999 = dma.done.wait (%p720_p4), %s564_s14, 128  }
 0x2b1   : > { %1001 = vsyncadd (%p720_p4), %s564_s14, 4294967168  ;;  %s25_s23 = sadd.s32 1, %s1024_s23   ;;  %s1279_s25 = sld [smem:[#allocation19_spill]] }
 0x2b2   : > { %p22_p7 = scmp.ge.s32.totalorder %s25_s23, 4   ;;  %s1280_s20 = sld [smem:[#allocation21_spill]] }
 0x2b3   : > { %s1281_s26 = sld [smem:[#allocation20_spill]]  ;;  %s1282_s18 = smov %s1008_s19 }
 0x2b4   : > { %s1284_s21 = smov %s1020_s22 }
 0x2b5   :  { %24 = sbr.rel (!%p22_p7) target bundleno = 12 (0xc), region = 110 }
 0x2b7   : > { %s1283_s19 = smov %s1279_s25 }
 0x2b9   : > { %s1285_s22 = smov %s1281_s26 }
 0x2ba   :  { %570 = vsyncpa [#allocation6], 1 }
 0x2bb   :  { %572 = vsyncpa [#allocation6 + $0x1], 1 }
 0x2bc   :  { %573 = vsyncpa [#allocation9], 1 }
 0x2bd   :  { %575 = vsyncpa [#allocation9 + $0x1], 1 }
 0x2be   :  { %576 = vsyncpa [#allocation12], 1 }
 0x2bf   :  { %577 = vsyncpa [#allocation7], 1 }
 0x2c0   :  { %579 = vsyncpa [#allocation7 + $0x1], 1 }

</bundles_post_ra>
